<compile_context>
chip_gen: v5e
topology: v5e:2x2
jax: 0.10.0
libtpu: 0.0.40
codegen_flags: <defaults>
</compile_context>

<pallas_src>
import math

import jax
import jax.numpy as jnp
from jax.experimental import pallas as pl
from jax.experimental.pallas import tpu as pltpu  # noqa: F401  (TPU backend)

# Small model config consistent with a transformer trajectory encoder.
B, S, D = 2, 8, 32
H = 4                 # attention heads
DK = D // H
DFF = 64
N_LAYERS = 2
EPS = 1e-6

R = B * S             # rows after folding batch into the sublane axis
HR = H * R            # lanes after packing all heads side by side


def _ln(v, a, b):
    """LayerNorm matching the PyTorch module: unbiased std, eps added to std."""
    mean = jnp.mean(v, axis=-1, keepdims=True)
    var = jnp.sum((v - mean) ** 2, axis=-1, keepdims=True) * (1.0 / (v.shape[-1] - 1))
    # approx=True (EUP) is too coarse for the 1e-4 check -> exact fallback.
    inv = pl.reciprocal(jnp.sqrt(var) + EPS, approx=False)
    return a * (v - mean) * inv + b


def encoder_kernel(x_ref, bias_ref, hmask_ref, bones_ref,
                   wq_ref, wk_ref, wv_ref, wo_ref,
                   bq_ref, bk_ref, bv_ref, bo_ref,
                   w1_ref, b1_ref, w2_ref, b2_ref,
                   lna_ref, lnb_ref, fa_ref, fb_ref,
                   o_ref):
    x = x_ref[...].astype(jnp.float32)      # (R, D)   whole batch in one shot
    bias = bias_ref[...]                    # (R, HR)  additive mask, built once
    hmask = hmask_ref[...]                  # (HR, D)  block-diagonal head selector
    bones = bones_ref[...]                  # (HR, HR) block-diagonal ones (block sums)
    scale = 1.0 / math.sqrt(DK)

    for i in range(N_LAYERS):               # tiny static unroll (N_LAYERS = 2)
        # --- sublayer 0: multi-head self-attention, pre-norm residual -------
        xn = _ln(x, lna_ref[2 * i], lnb_ref[2 * i])
        # lazy per-layer weight reads keep live ranges per-layer (no spills)
        q = jnp.dot(xn, wq_ref[i], preferred_element_type=jnp.float32) + bq_ref[i]
        k = jnp.dot(xn, wk_ref[i], preferred_element_type=jnp.float32) + bk_ref[i]
        v = jnp.dot(xn, wv_ref[i], preferred_element_type=jnp.float32) + bv_ref[i]

        # Pack heads along lanes with block-diagonal K / V (no slices/concat).
        k_bd = jnp.tile(k, (H, 1)) * hmask                  # (HR, D)
        v_bd = jnp.tile(v, (H, 1)) * hmask                  # (HR, D)

        # scores[r, h*R + s] = <q_h[r], k_h[s]> ; one MXU pass for all heads.
        sc = jax.lax.dot_general(q, k_bd, (((1,), (1,)), ((), ())),
                                 preferred_element_type=jnp.float32)
        sc = sc * scale + bias                              # (R, HR)

        # Segmented (per-head-block) softmax.  Softmax is shift-invariant per
        # block, so the per-row global max is a valid stabilizer; masked
        # entries sit at -1e9 and underflow to exactly 0 after the exp.
        p = jnp.exp(sc - jnp.max(sc, axis=-1, keepdims=True))
        denom = jnp.dot(p, bones, preferred_element_type=jnp.float32)  # block sums, pre-broadcast
        p = p * pl.reciprocal(denom, approx=False)

        attn = jnp.dot(p, v_bd, preferred_element_type=jnp.float32)    # (R, D), heads merged
        attn = jnp.dot(attn, wo_ref[i], preferred_element_type=jnp.float32) + bo_ref[i]
        x = x + attn                          # dropout omitted (eval mode)

        # --- sublayer 1: position-wise feed-forward, pre-norm residual ------
        xn = _ln(x, lna_ref[2 * i + 1], lnb_ref[2 * i + 1])
        hft = jnp.maximum(
            jnp.dot(xn, w1_ref[i], preferred_element_type=jnp.float32) + b1_ref[i], 0.0)
        x = x + jnp.dot(hft, w2_ref[i], preferred_element_type=jnp.float32) + b2_ref[i]

    o_ref[...] = _ln(x, fa_ref[...], fb_ref[...]).astype(o_ref.dtype)


def encoder_forward(x, mask, params):
    # Fold batch into sublanes: one pallas_call, no grid, everything in VMEM
    # (total footprint ~100 KB, far under any generation's VMEM limit).
    x2 = x.reshape(R, D)

    # Mask preprocessing hoisted completely out of the kernel loops: additive
    # bias encoding both the key mask and the "attend only within your batch"
    # rule, replicated once per head along lanes.
    row_b = jnp.arange(R, dtype=jnp.int32) // S              # batch id per row
    key_ok = mask.reshape(R) != 0
    valid = (row_b[:, None] == row_b[None, :]) & key_ok[None, :]
    bias = jnp.where(valid, 0.0, -1e9).astype(jnp.float32)   # (R, R)
    bias_tiled = jnp.tile(bias, (1, H))                      # (R, HR)

    # Constant block-diagonal selectors for the lane-packed-heads formulation.
    rows = jnp.arange(HR, dtype=jnp.int32)
    cols = jnp.arange(D, dtype=jnp.int32)
    hmask = (rows[:, None] // R == cols[None, :] // DK).astype(jnp.float32)   # (HR, D)
    bones = (rows[:, None] // R == rows[None, :] // R).astype(jnp.float32)    # (HR, HR)

    out = pl.pallas_call(
        encoder_kernel,
        out_shape=jax.ShapeDtypeStruct((R, D), jnp.float32),
    )(x2, bias_tiled, hmask, bones, *params)
    return out.reshape(B, S, D)


def encoder_ref(x, mask, params):
    """Pure-JAX reference: straightforward per-batch, per-head formulation."""
    (wq, wk, wv, wo, bq, bk, bv, bo, w1, b1, w2, b2, lna, lnb, fa, fb) = params

    def ln(v, a, b):
        mean = v.mean(-1, keepdims=True)
        var = ((v - mean) ** 2).sum(-1, keepdims=True) / (v.shape[-1] - 1)
        return a * (v - mean) / (jnp.sqrt(var) + EPS) + b

    def one(xb, mb):                          # xb: (S, D), mb: (1, S)
        xc = xb
        for i in range(N_LAYERS):
            xn = ln(xc, lna[2 * i, 0], lnb[2 * i, 0])
            q = xn @ wq[i] + bq[i, 0]
            k = xn @ wk[i] + bk[i, 0]
            v = xn @ wv[i] + bv[i, 0]
            heads = []
            for hh in range(H):
                lo, hi = hh * DK, (hh + 1) * DK
                sc = (q[:, lo:hi] @ k[:, lo:hi].T) / math.sqrt(DK)
                sc = jnp.where(mb == 0, -1e9, sc)
                heads.append(jax.nn.softmax(sc, axis=-1) @ v[:, lo:hi])
            attn = jnp.concatenate(heads, axis=-1) @ wo[i] + bo[i, 0]
            xc = xc + attn
            xn = ln(xc, lna[2 * i + 1, 0], lnb[2 * i + 1, 0])
            xc = xc + jnp.maximum(xn @ w1[i] + b1[i, 0], 0.0) @ w2[i] + b2[i, 0]
        return ln(xc, fa[0], fb[0])

    return jax.vmap(one)(x, mask)


if __name__ == "__main__":
    key = jax.random.PRNGKey(0)
    keys = jax.random.split(key, 16)

    def nrm(k, shape, s=0.05):
        return (jax.random.normal(k, shape) * s).astype(jnp.float32)

    def stack(a):
        # clones() deepcopies one layer, so all N layers start from identical
        # weights; mirror that by tiling the single-layer init.
        return jnp.tile(a[None], (N_LAYERS,) + (1,) * a.ndim)

    wq = stack(nrm(keys[0], (D, D)));    bq = stack(nrm(keys[1], (1, D)))
    wk = stack(nrm(keys[2], (D, D)));    bk = stack(nrm(keys[3], (1, D)))
    wv = stack(nrm(keys[4], (D, D)));    bv = stack(nrm(keys[5], (1, D)))
    wo = stack(nrm(keys[6], (D, D)));    bo = stack(nrm(keys[7], (1, D)))
    w1 = stack(nrm(keys[8], (D, DFF)));  b1 = stack(nrm(keys[9], (1, DFF)))
    w2 = stack(nrm(keys[10], (DFF, D))); b2 = stack(nrm(keys[11], (1, D)))
    lna = jnp.ones((2 * N_LAYERS, 1, D), jnp.float32)    # LayerNorm a_2 init
    lnb = jnp.zeros((2 * N_LAYERS, 1, D), jnp.float32)   # LayerNorm b_2 init
    fa = jnp.ones((1, D), jnp.float32)
    fb = jnp.zeros((1, D), jnp.float32)
    params = (wq, wk, wv, wo, bq, bk, bv, bo, w1, b1, w2, b2, lna, lnb, fa, fb)

    x = jax.random.normal(keys[12], (B, S, D), dtype=jnp.float32)
    mask = jnp.ones((B, 1, S), jnp.float32)
    mask = mask.at[0, 0, -2:].set(0.0)   # mask last 2 key positions of batch 0

    out = jax.block_until_ready(jax.jit(encoder_forward)(x, mask, params))
    ref = jax.block_until_ready(encoder_ref(x, mask, params))
    assert out.shape == (B, S, D)
    assert jnp.allclose(out, ref, atol=1e-4, rtol=1e-4), "mismatch vs reference"
    print("KERNEL_OK")
</pallas_src>

<mosaic_0001>
module attributes {stable_mosaic.version = 11 : i64} {
  func.func @encoder_kernel(%arg0: memref<16x32xf32, #tpu.memory_space<vmem>>, %arg1: memref<16x64xf32, #tpu.memory_space<vmem>>, %arg2: memref<64x32xf32, #tpu.memory_space<vmem>>, %arg3: memref<64x64xf32, #tpu.memory_space<vmem>>, %arg4: memref<2x32x32xf32, #tpu.memory_space<vmem>>, %arg5: memref<2x32x32xf32, #tpu.memory_space<vmem>>, %arg6: memref<2x32x32xf32, #tpu.memory_space<vmem>>, %arg7: memref<2x32x32xf32, #tpu.memory_space<vmem>>, %arg8: memref<2x1x32xf32, #tpu.memory_space<vmem>>, %arg9: memref<2x1x32xf32, #tpu.memory_space<vmem>>, %arg10: memref<2x1x32xf32, #tpu.memory_space<vmem>>, %arg11: memref<2x1x32xf32, #tpu.memory_space<vmem>>, %arg12: memref<2x32x64xf32, #tpu.memory_space<vmem>>, %arg13: memref<2x1x64xf32, #tpu.memory_space<vmem>>, %arg14: memref<2x64x32xf32, #tpu.memory_space<vmem>>, %arg15: memref<2x1x32xf32, #tpu.memory_space<vmem>>, %arg16: memref<4x1x32xf32, #tpu.memory_space<vmem>>, %arg17: memref<4x1x32xf32, #tpu.memory_space<vmem>>, %arg18: memref<1x32xf32, #tpu.memory_space<vmem>>, %arg19: memref<1x32xf32, #tpu.memory_space<vmem>>, %arg20: memref<16x32xf32, #tpu.memory_space<vmem>>) attributes {dimension_semantics = [], scalar_prefetch = 0 : i64, scratch_operands = 0 : i64, tpu.core_type = #tpu.core_type<tc>} {
    %c0 = arith.constant 0 : index
    %c0_0 = arith.constant 0 : index
    %0 = vector.load %arg0[%c0, %c0_0] : memref<16x32xf32, #tpu.memory_space<vmem>>, vector<16x32xf32>
    %c0_1 = arith.constant 0 : index
    %c0_2 = arith.constant 0 : index
    %1 = vector.load %arg1[%c0_1, %c0_2] : memref<16x64xf32, #tpu.memory_space<vmem>>, vector<16x64xf32>
    %c0_3 = arith.constant 0 : index
    %c0_4 = arith.constant 0 : index
    %2 = vector.load %arg2[%c0_3, %c0_4] : memref<64x32xf32, #tpu.memory_space<vmem>>, vector<64x32xf32>
    %c0_5 = arith.constant 0 : index
    %c0_6 = arith.constant 0 : index
    %3 = vector.load %arg3[%c0_5, %c0_6] : memref<64x64xf32, #tpu.memory_space<vmem>>, vector<64x64xf32>
    %c0_7 = arith.constant 0 : index
    %c0_8 = arith.constant 0 : index
    %c0_9 = arith.constant 0 : index
    %4 = vector.load %arg16[%c0_7, %c0_8, %c0_9] : memref<4x1x32xf32, #tpu.memory_space<vmem>>, vector<1x1x32xf32>
    %5 = vector.shape_cast %4 : vector<1x1x32xf32> to vector<1x32xf32>
    %c0_10 = arith.constant 0 : index
    %c0_11 = arith.constant 0 : index
    %c0_12 = arith.constant 0 : index
    %6 = vector.load %arg17[%c0_10, %c0_11, %c0_12] : memref<4x1x32xf32, #tpu.memory_space<vmem>>, vector<1x1x32xf32>
    %7 = vector.shape_cast %6 : vector<1x1x32xf32> to vector<1x32xf32>
    %cst = arith.constant dense<0.000000e+00> : vector<16xf32>
    %8 = vector.multi_reduction <add>, %0, %cst [1] : vector<16x32xf32> to vector<16xf32>
    %9 = vector.shape_cast %8 : vector<16xf32> to vector<16x1xf32>
    %cst_13 = arith.constant 3.200000e+01 : f32
    %10 = vector.broadcast %cst_13 : f32 to vector<16x1xf32>
    %11 = arith.divf %9, %10 : vector<16x1xf32>
    %12 = vector.broadcast %11 : vector<16x1xf32> to vector<16x32xf32>
    %13 = arith.subf %0, %12 : vector<16x32xf32>
    %14 = arith.mulf %13, %13 : vector<16x32xf32>
    %cst_14 = arith.constant dense<0.000000e+00> : vector<16xf32>
    %15 = vector.multi_reduction <add>, %14, %cst_14 [1] : vector<16x32xf32> to vector<16xf32>
    %16 = vector.shape_cast %15 : vector<16xf32> to vector<16x1xf32>
    %cst_15 = arith.constant 0.0322580636 : f32
    %17 = vector.broadcast %cst_15 : f32 to vector<16x1xf32>
    %18 = arith.mulf %16, %17 : vector<16x1xf32>
    %19 = math.sqrt %18 : vector<16x1xf32>
    %cst_16 = arith.constant 9.99999997E-7 : f32
    %20 = vector.broadcast %cst_16 : f32 to vector<16x1xf32>
    %21 = arith.addf %19, %20 : vector<16x1xf32>
    %22 = tpu.reciprocal %21 : vector<16x1xf32> -> vector<16x1xf32>
    %23 = vector.broadcast %11 : vector<16x1xf32> to vector<16x32xf32>
    %24 = arith.subf %0, %23 : vector<16x32xf32>
    %25 = vector.broadcast %5 : vector<1x32xf32> to vector<16x32xf32>
    %26 = arith.mulf %25, %24 : vector<16x32xf32>
    %27 = vector.broadcast %22 : vector<16x1xf32> to vector<16x32xf32>
    %28 = arith.mulf %26, %27 : vector<16x32xf32>
    %29 = vector.broadcast %7 : vector<1x32xf32> to vector<16x32xf32>
    %30 = arith.addf %28, %29 : vector<16x32xf32>
    %c0_17 = arith.constant 0 : index
    %c0_18 = arith.constant 0 : index
    %c0_19 = arith.constant 0 : index
    %31 = vector.load %arg4[%c0_17, %c0_18, %c0_19] : memref<2x32x32xf32, #tpu.memory_space<vmem>>, vector<1x32x32xf32>
    %32 = vector.shape_cast %31 : vector<1x32x32xf32> to vector<32x32xf32>
    %cst_20 = arith.constant dense<0.000000e+00> : vector<16x32xf32>
    %33 = tpu.matmul %30, %32, %cst_20 {dimension_numbers = #tpu.dot_dimension_numbers<[1], [0], [0], [1], [0, 0, 1, 1], [], []>} : vector<16x32xf32>, vector<32x32xf32>, vector<16x32xf32> -> vector<16x32xf32>
    %c0_21 = arith.constant 0 : index
    %c0_22 = arith.constant 0 : index
    %c0_23 = arith.constant 0 : index
    %34 = vector.load %arg8[%c0_21, %c0_22, %c0_23] : memref<2x1x32xf32, #tpu.memory_space<vmem>>, vector<1x1x32xf32>
    %35 = vector.shape_cast %34 : vector<1x1x32xf32> to vector<1x32xf32>
    %36 = vector.broadcast %35 : vector<1x32xf32> to vector<16x32xf32>
    %37 = arith.addf %33, %36 : vector<16x32xf32>
    %c0_24 = arith.constant 0 : index
    %c0_25 = arith.constant 0 : index
    %c0_26 = arith.constant 0 : index
    %38 = vector.load %arg5[%c0_24, %c0_25, %c0_26] : memref<2x32x32xf32, #tpu.memory_space<vmem>>, vector<1x32x32xf32>
    %39 = vector.shape_cast %38 : vector<1x32x32xf32> to vector<32x32xf32>
    %cst_27 = arith.constant dense<0.000000e+00> : vector<16x32xf32>
    %40 = tpu.matmul %30, %39, %cst_27 {dimension_numbers = #tpu.dot_dimension_numbers<[1], [0], [0], [1], [0, 0, 1, 1], [], []>} : vector<16x32xf32>, vector<32x32xf32>, vector<16x32xf32> -> vector<16x32xf32>
    %c0_28 = arith.constant 0 : index
    %c0_29 = arith.constant 0 : index
    %c0_30 = arith.constant 0 : index
    %41 = vector.load %arg9[%c0_28, %c0_29, %c0_30] : memref<2x1x32xf32, #tpu.memory_space<vmem>>, vector<1x1x32xf32>
    %42 = vector.shape_cast %41 : vector<1x1x32xf32> to vector<1x32xf32>
    %43 = vector.broadcast %42 : vector<1x32xf32> to vector<16x32xf32>
    %44 = arith.addf %40, %43 : vector<16x32xf32>
    %c0_31 = arith.constant 0 : index
    %c0_32 = arith.constant 0 : index
    %c0_33 = arith.constant 0 : index
    %45 = vector.load %arg6[%c0_31, %c0_32, %c0_33] : memref<2x32x32xf32, #tpu.memory_space<vmem>>, vector<1x32x32xf32>
    %46 = vector.shape_cast %45 : vector<1x32x32xf32> to vector<32x32xf32>
    %cst_34 = arith.constant dense<0.000000e+00> : vector<16x32xf32>
    %47 = tpu.matmul %30, %46, %cst_34 {dimension_numbers = #tpu.dot_dimension_numbers<[1], [0], [0], [1], [0, 0, 1, 1], [], []>} : vector<16x32xf32>, vector<32x32xf32>, vector<16x32xf32> -> vector<16x32xf32>
    %c0_35 = arith.constant 0 : index
    %c0_36 = arith.constant 0 : index
    %c0_37 = arith.constant 0 : index
    %48 = vector.load %arg10[%c0_35, %c0_36, %c0_37] : memref<2x1x32xf32, #tpu.memory_space<vmem>>, vector<1x1x32xf32>
    %49 = vector.shape_cast %48 : vector<1x1x32xf32> to vector<1x32xf32>
    %50 = vector.broadcast %49 : vector<1x32xf32> to vector<16x32xf32>
    %51 = arith.addf %47, %50 : vector<16x32xf32>
    %52 = tpu.concatenate %44, %44, %44, %44 in 0 : vector<16x32xf32>, vector<16x32xf32>, vector<16x32xf32>, vector<16x32xf32> -> vector<64x32xf32>
    %53 = arith.mulf %52, %2 : vector<64x32xf32>
    %54 = tpu.concatenate %51, %51, %51, %51 in 0 : vector<16x32xf32>, vector<16x32xf32>, vector<16x32xf32>, vector<16x32xf32> -> vector<64x32xf32>
    %55 = arith.mulf %54, %2 : vector<64x32xf32>
    %cst_38 = arith.constant dense<0.000000e+00> : vector<16x64xf32>
    %56 = tpu.matmul %37, %53, %cst_38 {dimension_numbers = #tpu.dot_dimension_numbers<[1], [1], [0], [0], [0, 0, 1, 0], [], []>} : vector<16x32xf32>, vector<64x32xf32>, vector<16x64xf32> -> vector<16x64xf32>
    %cst_39 = arith.constant 0.353553385 : f32
    %57 = vector.broadcast %cst_39 : f32 to vector<16x64xf32>
    %58 = arith.mulf %56, %57 : vector<16x64xf32>
    %59 = arith.addf %58, %1 : vector<16x64xf32>
    %cst_40 = arith.constant dense<0xFF800000> : vector<16xf32>
    %60 = vector.multi_reduction <maximumf>, %59, %cst_40 [1] : vector<16x64xf32> to vector<16xf32>
    %61 = vector.shape_cast %60 : vector<16xf32> to vector<16x1xf32>
    %62 = vector.broadcast %61 : vector<16x1xf32> to vector<16x64xf32>
    %63 = arith.subf %59, %62 : vector<16x64xf32>
    %64 = math.exp %63 : vector<16x64xf32>
    %cst_41 = arith.constant dense<0.000000e+00> : vector<16x64xf32>
    %65 = tpu.matmul %64, %3, %cst_41 {dimension_numbers = #tpu.dot_dimension_numbers<[1], [0], [0], [1], [0, 0, 1, 1], [], []>} : vector<16x64xf32>, vector<64x64xf32>, vector<16x64xf32> -> vector<16x64xf32>
    %66 = tpu.reciprocal %65 : vector<16x64xf32> -> vector<16x64xf32>
    %67 = arith.mulf %64, %66 : vector<16x64xf32>
    %cst_42 = arith.constant dense<0.000000e+00> : vector<16x32xf32>
    %68 = tpu.matmul %67, %55, %cst_42 {dimension_numbers = #tpu.dot_dimension_numbers<[1], [0], [0], [1], [0, 0, 1, 1], [], []>} : vector<16x64xf32>, vector<64x32xf32>, vector<16x32xf32> -> vector<16x32xf32>
    %c0_43 = arith.constant 0 : index
    %c0_44 = arith.constant 0 : index
    %c0_45 = arith.constant 0 : index
    %69 = vector.load %arg7[%c0_43, %c0_44, %c0_45] : memref<2x32x32xf32, #tpu.memory_space<vmem>>, vector<1x32x32xf32>
    %70 = vector.shape_cast %69 : vector<1x32x32xf32> to vector<32x32xf32>
    %cst_46 = arith.constant dense<0.000000e+00> : vector<16x32xf32>
    %71 = tpu.matmul %68, %70, %cst_46 {dimension_numbers = #tpu.dot_dimension_numbers<[1], [0], [0], [1], [0, 0, 1, 1], [], []>} : vector<16x32xf32>, vector<32x32xf32>, vector<16x32xf32> -> vector<16x32xf32>
    %c0_47 = arith.constant 0 : index
    %c0_48 = arith.constant 0 : index
    %c0_49 = arith.constant 0 : index
    %72 = vector.load %arg11[%c0_47, %c0_48, %c0_49] : memref<2x1x32xf32, #tpu.memory_space<vmem>>, vector<1x1x32xf32>
    %73 = vector.shape_cast %72 : vector<1x1x32xf32> to vector<1x32xf32>
    %74 = vector.broadcast %73 : vector<1x32xf32> to vector<16x32xf32>
    %75 = arith.addf %71, %74 : vector<16x32xf32>
    %76 = arith.addf %0, %75 : vector<16x32xf32>
    %c1 = arith.constant 1 : index
    %c0_50 = arith.constant 0 : index
    %c0_51 = arith.constant 0 : index
    %77 = vector.load %arg16[%c1, %c0_50, %c0_51] : memref<4x1x32xf32, #tpu.memory_space<vmem>>, vector<1x1x32xf32>
    %78 = vector.shape_cast %77 : vector<1x1x32xf32> to vector<1x32xf32>
    %c1_52 = arith.constant 1 : index
    %c0_53 = arith.constant 0 : index
    %c0_54 = arith.constant 0 : index
    %79 = vector.load %arg17[%c1_52, %c0_53, %c0_54] : memref<4x1x32xf32, #tpu.memory_space<vmem>>, vector<1x1x32xf32>
    %80 = vector.shape_cast %79 : vector<1x1x32xf32> to vector<1x32xf32>
    %cst_55 = arith.constant dense<0.000000e+00> : vector<16xf32>
    %81 = vector.multi_reduction <add>, %76, %cst_55 [1] : vector<16x32xf32> to vector<16xf32>
    %82 = vector.shape_cast %81 : vector<16xf32> to vector<16x1xf32>
    %cst_56 = arith.constant 3.200000e+01 : f32
    %83 = vector.broadcast %cst_56 : f32 to vector<16x1xf32>
    %84 = arith.divf %82, %83 : vector<16x1xf32>
    %85 = vector.broadcast %84 : vector<16x1xf32> to vector<16x32xf32>
    %86 = arith.subf %76, %85 : vector<16x32xf32>
    %87 = arith.mulf %86, %86 : vector<16x32xf32>
    %cst_57 = arith.constant dense<0.000000e+00> : vector<16xf32>
    %88 = vector.multi_reduction <add>, %87, %cst_57 [1] : vector<16x32xf32> to vector<16xf32>
    %89 = vector.shape_cast %88 : vector<16xf32> to vector<16x1xf32>
    %cst_58 = arith.constant 0.0322580636 : f32
    %90 = vector.broadcast %cst_58 : f32 to vector<16x1xf32>
    %91 = arith.mulf %89, %90 : vector<16x1xf32>
    %92 = math.sqrt %91 : vector<16x1xf32>
    %cst_59 = arith.constant 9.99999997E-7 : f32
    %93 = vector.broadcast %cst_59 : f32 to vector<16x1xf32>
    %94 = arith.addf %92, %93 : vector<16x1xf32>
    %95 = tpu.reciprocal %94 : vector<16x1xf32> -> vector<16x1xf32>
    %96 = vector.broadcast %84 : vector<16x1xf32> to vector<16x32xf32>
    %97 = arith.subf %76, %96 : vector<16x32xf32>
    %98 = vector.broadcast %78 : vector<1x32xf32> to vector<16x32xf32>
    %99 = arith.mulf %98, %97 : vector<16x32xf32>
    %100 = vector.broadcast %95 : vector<16x1xf32> to vector<16x32xf32>
    %101 = arith.mulf %99, %100 : vector<16x32xf32>
    %102 = vector.broadcast %80 : vector<1x32xf32> to vector<16x32xf32>
    %103 = arith.addf %101, %102 : vector<16x32xf32>
    %c0_60 = arith.constant 0 : index
    %c0_61 = arith.constant 0 : index
    %c0_62 = arith.constant 0 : index
    %104 = vector.load %arg12[%c0_60, %c0_61, %c0_62] : memref<2x32x64xf32, #tpu.memory_space<vmem>>, vector<1x32x64xf32>
    %105 = vector.shape_cast %104 : vector<1x32x64xf32> to vector<32x64xf32>
    %cst_63 = arith.constant dense<0.000000e+00> : vector<16x64xf32>
    %106 = tpu.matmul %103, %105, %cst_63 {dimension_numbers = #tpu.dot_dimension_numbers<[1], [0], [0], [1], [0, 0, 1, 1], [], []>} : vector<16x32xf32>, vector<32x64xf32>, vector<16x64xf32> -> vector<16x64xf32>
    %c0_64 = arith.constant 0 : index
    %c0_65 = arith.constant 0 : index
    %c0_66 = arith.constant 0 : index
    %107 = vector.load %arg13[%c0_64, %c0_65, %c0_66] : memref<2x1x64xf32, #tpu.memory_space<vmem>>, vector<1x1x64xf32>
    %108 = vector.shape_cast %107 : vector<1x1x64xf32> to vector<1x64xf32>
    %109 = vector.broadcast %108 : vector<1x64xf32> to vector<16x64xf32>
    %110 = arith.addf %106, %109 : vector<16x64xf32>
    %cst_67 = arith.constant 0.000000e+00 : f32
    %111 = vector.broadcast %cst_67 : f32 to vector<16x64xf32>
    %112 = arith.maximumf %110, %111 : vector<16x64xf32>
    %c0_68 = arith.constant 0 : index
    %c0_69 = arith.constant 0 : index
    %c0_70 = arith.constant 0 : index
    %113 = vector.load %arg14[%c0_68, %c0_69, %c0_70] : memref<2x64x32xf32, #tpu.memory_space<vmem>>, vector<1x64x32xf32>
    %114 = vector.shape_cast %113 : vector<1x64x32xf32> to vector<64x32xf32>
    %cst_71 = arith.constant dense<0.000000e+00> : vector<16x32xf32>
    %115 = tpu.matmul %112, %114, %cst_71 {dimension_numbers = #tpu.dot_dimension_numbers<[1], [0], [0], [1], [0, 0, 1, 1], [], []>} : vector<16x64xf32>, vector<64x32xf32>, vector<16x32xf32> -> vector<16x32xf32>
    %116 = arith.addf %76, %115 : vector<16x32xf32>
    %c0_72 = arith.constant 0 : index
    %c0_73 = arith.constant 0 : index
    %c0_74 = arith.constant 0 : index
    %117 = vector.load %arg15[%c0_72, %c0_73, %c0_74] : memref<2x1x32xf32, #tpu.memory_space<vmem>>, vector<1x1x32xf32>
    %118 = vector.shape_cast %117 : vector<1x1x32xf32> to vector<1x32xf32>
    %119 = vector.broadcast %118 : vector<1x32xf32> to vector<16x32xf32>
    %120 = arith.addf %116, %119 : vector<16x32xf32>
    %c2 = arith.constant 2 : index
    %c0_75 = arith.constant 0 : index
    %c0_76 = arith.constant 0 : index
    %121 = vector.load %arg16[%c2, %c0_75, %c0_76] : memref<4x1x32xf32, #tpu.memory_space<vmem>>, vector<1x1x32xf32>
    %122 = vector.shape_cast %121 : vector<1x1x32xf32> to vector<1x32xf32>
    %c2_77 = arith.constant 2 : index
    %c0_78 = arith.constant 0 : index
    %c0_79 = arith.constant 0 : index
    %123 = vector.load %arg17[%c2_77, %c0_78, %c0_79] : memref<4x1x32xf32, #tpu.memory_space<vmem>>, vector<1x1x32xf32>
    %124 = vector.shape_cast %123 : vector<1x1x32xf32> to vector<1x32xf32>
    %cst_80 = arith.constant dense<0.000000e+00> : vector<16xf32>
    %125 = vector.multi_reduction <add>, %120, %cst_80 [1] : vector<16x32xf32> to vector<16xf32>
    %126 = vector.shape_cast %125 : vector<16xf32> to vector<16x1xf32>
    %cst_81 = arith.constant 3.200000e+01 : f32
    %127 = vector.broadcast %cst_81 : f32 to vector<16x1xf32>
    %128 = arith.divf %126, %127 : vector<16x1xf32>
    %129 = vector.broadcast %128 : vector<16x1xf32> to vector<16x32xf32>
    %130 = arith.subf %120, %129 : vector<16x32xf32>
    %131 = arith.mulf %130, %130 : vector<16x32xf32>
    %cst_82 = arith.constant dense<0.000000e+00> : vector<16xf32>
    %132 = vector.multi_reduction <add>, %131, %cst_82 [1] : vector<16x32xf32> to vector<16xf32>
    %133 = vector.shape_cast %132 : vector<16xf32> to vector<16x1xf32>
    %cst_83 = arith.constant 0.0322580636 : f32
    %134 = vector.broadcast %cst_83 : f32 to vector<16x1xf32>
    %135 = arith.mulf %133, %134 : vector<16x1xf32>
    %136 = math.sqrt %135 : vector<16x1xf32>
    %cst_84 = arith.constant 9.99999997E-7 : f32
    %137 = vector.broadcast %cst_84 : f32 to vector<16x1xf32>
    %138 = arith.addf %136, %137 : vector<16x1xf32>
    %139 = tpu.reciprocal %138 : vector<16x1xf32> -> vector<16x1xf32>
    %140 = vector.broadcast %128 : vector<16x1xf32> to vector<16x32xf32>
    %141 = arith.subf %120, %140 : vector<16x32xf32>
    %142 = vector.broadcast %122 : vector<1x32xf32> to vector<16x32xf32>
    %143 = arith.mulf %142, %141 : vector<16x32xf32>
    %144 = vector.broadcast %139 : vector<16x1xf32> to vector<16x32xf32>
    %145 = arith.mulf %143, %144 : vector<16x32xf32>
    %146 = vector.broadcast %124 : vector<1x32xf32> to vector<16x32xf32>
    %147 = arith.addf %145, %146 : vector<16x32xf32>
    %c1_85 = arith.constant 1 : index
    %c0_86 = arith.constant 0 : index
    %c0_87 = arith.constant 0 : index
    %148 = vector.load %arg4[%c1_85, %c0_86, %c0_87] : memref<2x32x32xf32, #tpu.memory_space<vmem>>, vector<1x32x32xf32>
    %149 = vector.shape_cast %148 : vector<1x32x32xf32> to vector<32x32xf32>
    %cst_88 = arith.constant dense<0.000000e+00> : vector<16x32xf32>
    %150 = tpu.matmul %147, %149, %cst_88 {dimension_numbers = #tpu.dot_dimension_numbers<[1], [0], [0], [1], [0, 0, 1, 1], [], []>} : vector<16x32xf32>, vector<32x32xf32>, vector<16x32xf32> -> vector<16x32xf32>
    %c1_89 = arith.constant 1 : index
    %c0_90 = arith.constant 0 : index
    %c0_91 = arith.constant 0 : index
    %151 = vector.load %arg8[%c1_89, %c0_90, %c0_91] : memref<2x1x32xf32, #tpu.memory_space<vmem>>, vector<1x1x32xf32>
    %152 = vector.shape_cast %151 : vector<1x1x32xf32> to vector<1x32xf32>
    %153 = vector.broadcast %152 : vector<1x32xf32> to vector<16x32xf32>
    %154 = arith.addf %150, %153 : vector<16x32xf32>
    %c1_92 = arith.constant 1 : index
    %c0_93 = arith.constant 0 : index
    %c0_94 = arith.constant 0 : index
    %155 = vector.load %arg5[%c1_92, %c0_93, %c0_94] : memref<2x32x32xf32, #tpu.memory_space<vmem>>, vector<1x32x32xf32>
    %156 = vector.shape_cast %155 : vector<1x32x32xf32> to vector<32x32xf32>
    %cst_95 = arith.constant dense<0.000000e+00> : vector<16x32xf32>
    %157 = tpu.matmul %147, %156, %cst_95 {dimension_numbers = #tpu.dot_dimension_numbers<[1], [0], [0], [1], [0, 0, 1, 1], [], []>} : vector<16x32xf32>, vector<32x32xf32>, vector<16x32xf32> -> vector<16x32xf32>
    %c1_96 = arith.constant 1 : index
    %c0_97 = arith.constant 0 : index
    %c0_98 = arith.constant 0 : index
    %158 = vector.load %arg9[%c1_96, %c0_97, %c0_98] : memref<2x1x32xf32, #tpu.memory_space<vmem>>, vector<1x1x32xf32>
    %159 = vector.shape_cast %158 : vector<1x1x32xf32> to vector<1x32xf32>
    %160 = vector.broadcast %159 : vector<1x32xf32> to vector<16x32xf32>
    %161 = arith.addf %157, %160 : vector<16x32xf32>
    %c1_99 = arith.constant 1 : index
    %c0_100 = arith.constant 0 : index
    %c0_101 = arith.constant 0 : index
    %162 = vector.load %arg6[%c1_99, %c0_100, %c0_101] : memref<2x32x32xf32, #tpu.memory_space<vmem>>, vector<1x32x32xf32>
    %163 = vector.shape_cast %162 : vector<1x32x32xf32> to vector<32x32xf32>
    %cst_102 = arith.constant dense<0.000000e+00> : vector<16x32xf32>
    %164 = tpu.matmul %147, %163, %cst_102 {dimension_numbers = #tpu.dot_dimension_numbers<[1], [0], [0], [1], [0, 0, 1, 1], [], []>} : vector<16x32xf32>, vector<32x32xf32>, vector<16x32xf32> -> vector<16x32xf32>
    %c1_103 = arith.constant 1 : index
    %c0_104 = arith.constant 0 : index
    %c0_105 = arith.constant 0 : index
    %165 = vector.load %arg10[%c1_103, %c0_104, %c0_105] : memref<2x1x32xf32, #tpu.memory_space<vmem>>, vector<1x1x32xf32>
    %166 = vector.shape_cast %165 : vector<1x1x32xf32> to vector<1x32xf32>
    %167 = vector.broadcast %166 : vector<1x32xf32> to vector<16x32xf32>
    %168 = arith.addf %164, %167 : vector<16x32xf32>
    %169 = tpu.concatenate %161, %161, %161, %161 in 0 : vector<16x32xf32>, vector<16x32xf32>, vector<16x32xf32>, vector<16x32xf32> -> vector<64x32xf32>
    %170 = arith.mulf %169, %2 : vector<64x32xf32>
    %171 = tpu.concatenate %168, %168, %168, %168 in 0 : vector<16x32xf32>, vector<16x32xf32>, vector<16x32xf32>, vector<16x32xf32> -> vector<64x32xf32>
    %172 = arith.mulf %171, %2 : vector<64x32xf32>
    %cst_106 = arith.constant dense<0.000000e+00> : vector<16x64xf32>
    %173 = tpu.matmul %154, %170, %cst_106 {dimension_numbers = #tpu.dot_dimension_numbers<[1], [1], [0], [0], [0, 0, 1, 0], [], []>} : vector<16x32xf32>, vector<64x32xf32>, vector<16x64xf32> -> vector<16x64xf32>
    %cst_107 = arith.constant 0.353553385 : f32
    %174 = vector.broadcast %cst_107 : f32 to vector<16x64xf32>
    %175 = arith.mulf %173, %174 : vector<16x64xf32>
    %176 = arith.addf %175, %1 : vector<16x64xf32>
    %cst_108 = arith.constant dense<0xFF800000> : vector<16xf32>
    %177 = vector.multi_reduction <maximumf>, %176, %cst_108 [1] : vector<16x64xf32> to vector<16xf32>
    %178 = vector.shape_cast %177 : vector<16xf32> to vector<16x1xf32>
    %179 = vector.broadcast %178 : vector<16x1xf32> to vector<16x64xf32>
    %180 = arith.subf %176, %179 : vector<16x64xf32>
    %181 = math.exp %180 : vector<16x64xf32>
    %cst_109 = arith.constant dense<0.000000e+00> : vector<16x64xf32>
    %182 = tpu.matmul %181, %3, %cst_109 {dimension_numbers = #tpu.dot_dimension_numbers<[1], [0], [0], [1], [0, 0, 1, 1], [], []>} : vector<16x64xf32>, vector<64x64xf32>, vector<16x64xf32> -> vector<16x64xf32>
    %183 = tpu.reciprocal %182 : vector<16x64xf32> -> vector<16x64xf32>
    %184 = arith.mulf %181, %183 : vector<16x64xf32>
    %cst_110 = arith.constant dense<0.000000e+00> : vector<16x32xf32>
    %185 = tpu.matmul %184, %172, %cst_110 {dimension_numbers = #tpu.dot_dimension_numbers<[1], [0], [0], [1], [0, 0, 1, 1], [], []>} : vector<16x64xf32>, vector<64x32xf32>, vector<16x32xf32> -> vector<16x32xf32>
    %c1_111 = arith.constant 1 : index
    %c0_112 = arith.constant 0 : index
    %c0_113 = arith.constant 0 : index
    %186 = vector.load %arg7[%c1_111, %c0_112, %c0_113] : memref<2x32x32xf32, #tpu.memory_space<vmem>>, vector<1x32x32xf32>
    %187 = vector.shape_cast %186 : vector<1x32x32xf32> to vector<32x32xf32>
    %cst_114 = arith.constant dense<0.000000e+00> : vector<16x32xf32>
    %188 = tpu.matmul %185, %187, %cst_114 {dimension_numbers = #tpu.dot_dimension_numbers<[1], [0], [0], [1], [0, 0, 1, 1], [], []>} : vector<16x32xf32>, vector<32x32xf32>, vector<16x32xf32> -> vector<16x32xf32>
    %c1_115 = arith.constant 1 : index
    %c0_116 = arith.constant 0 : index
    %c0_117 = arith.constant 0 : index
    %189 = vector.load %arg11[%c1_115, %c0_116, %c0_117] : memref<2x1x32xf32, #tpu.memory_space<vmem>>, vector<1x1x32xf32>
    %190 = vector.shape_cast %189 : vector<1x1x32xf32> to vector<1x32xf32>
    %191 = vector.broadcast %190 : vector<1x32xf32> to vector<16x32xf32>
    %192 = arith.addf %188, %191 : vector<16x32xf32>
    %193 = arith.addf %120, %192 : vector<16x32xf32>
    %c3 = arith.constant 3 : index
    %c0_118 = arith.constant 0 : index
    %c0_119 = arith.constant 0 : index
    %194 = vector.load %arg16[%c3, %c0_118, %c0_119] : memref<4x1x32xf32, #tpu.memory_space<vmem>>, vector<1x1x32xf32>
    %195 = vector.shape_cast %194 : vector<1x1x32xf32> to vector<1x32xf32>
    %c3_120 = arith.constant 3 : index
    %c0_121 = arith.constant 0 : index
    %c0_122 = arith.constant 0 : index
    %196 = vector.load %arg17[%c3_120, %c0_121, %c0_122] : memref<4x1x32xf32, #tpu.memory_space<vmem>>, vector<1x1x32xf32>
    %197 = vector.shape_cast %196 : vector<1x1x32xf32> to vector<1x32xf32>
    %cst_123 = arith.constant dense<0.000000e+00> : vector<16xf32>
    %198 = vector.multi_reduction <add>, %193, %cst_123 [1] : vector<16x32xf32> to vector<16xf32>
    %199 = vector.shape_cast %198 : vector<16xf32> to vector<16x1xf32>
    %cst_124 = arith.constant 3.200000e+01 : f32
    %200 = vector.broadcast %cst_124 : f32 to vector<16x1xf32>
    %201 = arith.divf %199, %200 : vector<16x1xf32>
    %202 = vector.broadcast %201 : vector<16x1xf32> to vector<16x32xf32>
    %203 = arith.subf %193, %202 : vector<16x32xf32>
    %204 = arith.mulf %203, %203 : vector<16x32xf32>
    %cst_125 = arith.constant dense<0.000000e+00> : vector<16xf32>
    %205 = vector.multi_reduction <add>, %204, %cst_125 [1] : vector<16x32xf32> to vector<16xf32>
    %206 = vector.shape_cast %205 : vector<16xf32> to vector<16x1xf32>
    %cst_126 = arith.constant 0.0322580636 : f32
    %207 = vector.broadcast %cst_126 : f32 to vector<16x1xf32>
    %208 = arith.mulf %206, %207 : vector<16x1xf32>
    %209 = math.sqrt %208 : vector<16x1xf32>
    %cst_127 = arith.constant 9.99999997E-7 : f32
    %210 = vector.broadcast %cst_127 : f32 to vector<16x1xf32>
    %211 = arith.addf %209, %210 : vector<16x1xf32>
    %212 = tpu.reciprocal %211 : vector<16x1xf32> -> vector<16x1xf32>
    %213 = vector.broadcast %201 : vector<16x1xf32> to vector<16x32xf32>
    %214 = arith.subf %193, %213 : vector<16x32xf32>
    %215 = vector.broadcast %195 : vector<1x32xf32> to vector<16x32xf32>
    %216 = arith.mulf %215, %214 : vector<16x32xf32>
    %217 = vector.broadcast %212 : vector<16x1xf32> to vector<16x32xf32>
    %218 = arith.mulf %216, %217 : vector<16x32xf32>
    %219 = vector.broadcast %197 : vector<1x32xf32> to vector<16x32xf32>
    %220 = arith.addf %218, %219 : vector<16x32xf32>
    %c1_128 = arith.constant 1 : index
    %c0_129 = arith.constant 0 : index
    %c0_130 = arith.constant 0 : index
    %221 = vector.load %arg12[%c1_128, %c0_129, %c0_130] : memref<2x32x64xf32, #tpu.memory_space<vmem>>, vector<1x32x64xf32>
    %222 = vector.shape_cast %221 : vector<1x32x64xf32> to vector<32x64xf32>
    %cst_131 = arith.constant dense<0.000000e+00> : vector<16x64xf32>
    %223 = tpu.matmul %220, %222, %cst_131 {dimension_numbers = #tpu.dot_dimension_numbers<[1], [0], [0], [1], [0, 0, 1, 1], [], []>} : vector<16x32xf32>, vector<32x64xf32>, vector<16x64xf32> -> vector<16x64xf32>
    %c1_132 = arith.constant 1 : index
    %c0_133 = arith.constant 0 : index
    %c0_134 = arith.constant 0 : index
    %224 = vector.load %arg13[%c1_132, %c0_133, %c0_134] : memref<2x1x64xf32, #tpu.memory_space<vmem>>, vector<1x1x64xf32>
    %225 = vector.shape_cast %224 : vector<1x1x64xf32> to vector<1x64xf32>
    %226 = vector.broadcast %225 : vector<1x64xf32> to vector<16x64xf32>
    %227 = arith.addf %223, %226 : vector<16x64xf32>
    %cst_135 = arith.constant 0.000000e+00 : f32
    %228 = vector.broadcast %cst_135 : f32 to vector<16x64xf32>
    %229 = arith.maximumf %227, %228 : vector<16x64xf32>
    %c1_136 = arith.constant 1 : index
    %c0_137 = arith.constant 0 : index
    %c0_138 = arith.constant 0 : index
    %230 = vector.load %arg14[%c1_136, %c0_137, %c0_138] : memref<2x64x32xf32, #tpu.memory_space<vmem>>, vector<1x64x32xf32>
    %231 = vector.shape_cast %230 : vector<1x64x32xf32> to vector<64x32xf32>
    %cst_139 = arith.constant dense<0.000000e+00> : vector<16x32xf32>
    %232 = tpu.matmul %229, %231, %cst_139 {dimension_numbers = #tpu.dot_dimension_numbers<[1], [0], [0], [1], [0, 0, 1, 1], [], []>} : vector<16x64xf32>, vector<64x32xf32>, vector<16x32xf32> -> vector<16x32xf32>
    %233 = arith.addf %193, %232 : vector<16x32xf32>
    %c1_140 = arith.constant 1 : index
    %c0_141 = arith.constant 0 : index
    %c0_142 = arith.constant 0 : index
    %234 = vector.load %arg15[%c1_140, %c0_141, %c0_142] : memref<2x1x32xf32, #tpu.memory_space<vmem>>, vector<1x1x32xf32>
    %235 = vector.shape_cast %234 : vector<1x1x32xf32> to vector<1x32xf32>
    %236 = vector.broadcast %235 : vector<1x32xf32> to vector<16x32xf32>
    %237 = arith.addf %233, %236 : vector<16x32xf32>
    %c0_143 = arith.constant 0 : index
    %c0_144 = arith.constant 0 : index
    %238 = vector.load %arg18[%c0_143, %c0_144] : memref<1x32xf32, #tpu.memory_space<vmem>>, vector<1x32xf32>
    %c0_145 = arith.constant 0 : index
    %c0_146 = arith.constant 0 : index
    %239 = vector.load %arg19[%c0_145, %c0_146] : memref<1x32xf32, #tpu.memory_space<vmem>>, vector<1x32xf32>
    %cst_147 = arith.constant dense<0.000000e+00> : vector<16xf32>
    %240 = vector.multi_reduction <add>, %237, %cst_147 [1] : vector<16x32xf32> to vector<16xf32>
    %241 = vector.shape_cast %240 : vector<16xf32> to vector<16x1xf32>
    %cst_148 = arith.constant 3.200000e+01 : f32
    %242 = vector.broadcast %cst_148 : f32 to vector<16x1xf32>
    %243 = arith.divf %241, %242 : vector<16x1xf32>
    %244 = vector.broadcast %243 : vector<16x1xf32> to vector<16x32xf32>
    %245 = arith.subf %237, %244 : vector<16x32xf32>
    %246 = arith.mulf %245, %245 : vector<16x32xf32>
    %cst_149 = arith.constant dense<0.000000e+00> : vector<16xf32>
    %247 = vector.multi_reduction <add>, %246, %cst_149 [1] : vector<16x32xf32> to vector<16xf32>
    %248 = vector.shape_cast %247 : vector<16xf32> to vector<16x1xf32>
    %cst_150 = arith.constant 0.0322580636 : f32
    %249 = vector.broadcast %cst_150 : f32 to vector<16x1xf32>
    %250 = arith.mulf %248, %249 : vector<16x1xf32>
    %251 = math.sqrt %250 : vector<16x1xf32>
    %cst_151 = arith.constant 9.99999997E-7 : f32
    %252 = vector.broadcast %cst_151 : f32 to vector<16x1xf32>
    %253 = arith.addf %251, %252 : vector<16x1xf32>
    %254 = tpu.reciprocal %253 : vector<16x1xf32> -> vector<16x1xf32>
    %255 = vector.broadcast %243 : vector<16x1xf32> to vector<16x32xf32>
    %256 = arith.subf %237, %255 : vector<16x32xf32>
    %257 = vector.broadcast %238 : vector<1x32xf32> to vector<16x32xf32>
    %258 = arith.mulf %257, %256 : vector<16x32xf32>
    %259 = vector.broadcast %254 : vector<16x1xf32> to vector<16x32xf32>
    %260 = arith.mulf %258, %259 : vector<16x32xf32>
    %261 = vector.broadcast %239 : vector<1x32xf32> to vector<16x32xf32>
    %262 = arith.addf %260, %261 : vector<16x32xf32>
    %c0_152 = arith.constant 0 : index
    %c0_153 = arith.constant 0 : index
    %263 = vector.load %arg20[%c0_152, %c0_153] : memref<16x32xf32, #tpu.memory_space<vmem>>, vector<16x32xf32>
    tpu.vector_store %arg20[%c0_152, %c0_153], %262 {strides = array<i32>} : memref<16x32xf32, #tpu.memory_space<vmem>>, vector<16x32xf32>,
    return
  }
}

</mosaic_0001>

<bundles_post_ra>
// kernel: tile.9
= control target key start
LH: loop header
LB: loop body
LE: loop exit
PB: predicated region body
PF: predicated region fallthrough
CT: control target
= control target key end

     0   :  { %vm68_vm0 = vcmask 1047556   ;;  %s167_s9 = smov 32   ;;  %s168_s10 = smov 16   ;;  %vm70_vm1 = vcmask 130048   ;;  %vm89_vm2 = vcmask 523648   ;;  %vm110_vm3 = vcmask 392448   ;;  %s259_s0 = inlined_call_operand.vmem [shape: f32[16,4,16], index: 0, kind: input, shape index: {}]   ;;  %s260_s1 = inlined_call_operand.vmem [shape: f32[16,64], index: 1, kind: output, shape index: {}]  }
   0x1   :  { %v152_v0 = vld [vmem:[%s259_s0 + $0x1c] sm:$0xf]  ;;  %v153_v1 = vld [vmem:[%s259_s0 + $0x18] sm:$0xf]  ;;  %v154_v2 = vld [vmem:[%s259_s0 + $0x14] sm:$0xf] }
   0x2   :  { %39 = vst [vmem:[#allocation0 + $0x38] sm:$0xf] %v152_v0  ;;  %v155_v3 = vld [vmem:[%s259_s0 + $0x10] sm:$0xf]  ;;  %v156_v4 = vld [vmem:[%s259_s0 + $0xc] sm:$0xf] }
   0x3   :  { %43 = vst [vmem:[#allocation0 + $0x30] sm:$0xf] %v153_v1  ;;  %v157_v5 = vld [vmem:[%s259_s0 + $0x8] sm:$0xf]  ;;  %v158_v6 = vld [vmem:[%s259_s0 + $0x4] sm:$0xf] }
   0x4   :  { %47 = vst [vmem:[#allocation0 + $0x28] sm:$0xf] %v154_v2  ;;  %v64_v7 = vld [vmem:[%s259_s0] sm:$0xf]  ;;  %v144_v8 = vld [vmem:[%s259_s0 + $0x3c] sm:$0xf] }
   0x5   :  { %51 = vst [vmem:[#allocation0 + $0x20] sm:$0xf] %v155_v3  ;;  %v145_v9 = vld [vmem:[%s259_s0 + $0x38] sm:$0xf]  ;;  %v146_v10 = vld [vmem:[%s259_s0 + $0x34] sm:$0xf] }
   0x6   :  { %55 = vst [vmem:[#allocation0 + $0x18] sm:$0xf] %v156_v4  ;;  %v147_v11 = vld [vmem:[%s259_s0 + $0x30] sm:$0xf]  ;;  %v148_v12 = vld [vmem:[%s259_s0 + $0x2c] sm:$0xf] }
   0x7   :  { %59 = vst [vmem:[#allocation0 + $0x10] sm:$0xf] %v157_v5  ;;  %v149_v13 = vld [vmem:[%s259_s0 + $0x28] sm:$0xf]  ;;  %v150_v15 = vld [vmem:[%s259_s0 + $0x24] sm:$0xf] }
   0x8   :  { %63 = vst [vmem:[#allocation0 + $0x8] sm:$0xf] %v158_v6  ;;  %v151_v17 = vld [vmem:[%s259_s0 + $0x20] sm:$0xf]  ;;  %s166_s0 = smov 48   ;;  %vm131_vm4 = vcmask 261248  }
   0x9   :  { %65 = vst [vmem:[#allocation0] sm:$0xf] %v64_v7 }
   0xa   :  { %7 = vst [vmem:[#allocation0 + $0x78] sm:$0xf] %v144_v8 }
   0xb   :  { %11 = vst [vmem:[#allocation0 + $0x70] sm:$0xf] %v145_v9 }
   0xc   :  { %v84_v14 = vld [vmem:[#allocation0 + $0x3] ss:$8 sm:$0xf0]   ;;  %15 = vst [vmem:[#allocation0 + $0x68] sm:$0xf] %v146_v10 }
   0xd   :  { %v105_v16 = vld [vmem:[#allocation0 + $0x2] ss:$8 sm:$0xf0]   ;;  %19 = vst [vmem:[#allocation0 + $0x60] sm:$0xf] %v147_v11 }
   0xe   :  { %23 = vst [vmem:[#allocation0 + $0x58] sm:$0xf] %v148_v12  ;;  %v126_v18 = vld [vmem:[#allocation0 + $0x1] ss:$8 sm:$0xf0]  }
   0xf   :  { %27 = vst [vmem:[#allocation0 + $0x50] sm:$0xf] %v149_v13  ;;  %v67_v35 = vld [vmem:[#allocation0] ss:$8 sm:$0xf0]  }
  0x10   :  { %v82_v19 = vld [vmem:[#allocation0 + $0x3] ss:$8 sm:$0xf]   ;;  %v103_v20 = vld [vmem:[#allocation0 + $0x2] ss:$8 sm:$0xf]  }
  0x11   :  { %v86_v21 = vsel %vm68_vm0, %v84_v14, %v82_v19  ;;  %v107_v22 = vsel %vm68_vm0, %v105_v16, %v103_v20  ;;  %v124_v23 = vld [vmem:[#allocation0 + $0x1] ss:$8 sm:$0xf]   ;;  %31 = vst [vmem:[#allocation0 + $0x48] sm:$0xf] %v150_v15 }
  0x12   :  { %87 = vrot.lane.b32.xlu0 %v86_v21, %s166_s0  ;;  %108 = vrot.lane.b32.xlu1 %v107_v22, %s167_s9  ;;  %v128_v24 = vsel %vm68_vm0, %v126_v18, %v124_v23  ;;  %35 = vst [vmem:[#allocation0 + $0x40] sm:$0xf] %v151_v17  ;;  %v66_v34 = vld [vmem:[#allocation0] ss:$8 sm:$0xf]  }
  0x13   :  { %129 = vrot.lane.b32.xlu2 %v128_v24, %s168_s10  ;;  %v69_v36 = vsel %vm68_vm0, %v67_v35, %v66_v34 }
  0x14   :  { %v94_v25 = vld [vmem:[#allocation0 + $0x43] ss:$8 sm:$0xf0]   ;;  %v115_v26 = vld [vmem:[#allocation0 + $0x42] ss:$8 sm:$0xf0]  }
  0x15   :  { %v136_v27 = vld [vmem:[#allocation0 + $0x41] ss:$8 sm:$0xf0]   ;;  %71 = vst.msk [vmem:[%s260_s1] sm:$0xff] %vm70_vm1, %v69_v36  }
  0x16   :  { %v75_v38 = vld [vmem:[#allocation0 + $0x40] ss:$8 sm:$0xf0]  }
  0x19   :  { %v92_v28 = vld [vmem:[#allocation0 + $0x43] ss:$8 sm:$0xf]   ;;  %v113_v29 = vld [vmem:[#allocation0 + $0x42] ss:$8 sm:$0xf]  }
  0x1a   :  { %v96_v30 = vsel %vm68_vm0, %v94_v25, %v92_v28  ;;  %v117_v31 = vsel %vm68_vm0, %v115_v26, %v113_v29  ;;  %v134_v32 = vld [vmem:[#allocation0 + $0x41] ss:$8 sm:$0xf]   ;;  %v73_v37 = vld [vmem:[#allocation0 + $0x40] ss:$8 sm:$0xf]  }
  0x1b   :  { %97 = vrot.lane.b32.xlu0 %v96_v30, %s166_s0  ;;  %118 = vrot.lane.b32.xlu1 %v117_v31, %s167_s9  ;;  %v138_v33 = vsel %vm68_vm0, %v136_v27, %v134_v32  ;;  %v77_v40 = vsel %vm68_vm0, %v75_v38, %v73_v37 }
  0x1c   :  { %139 = vrot.lane.b32.xlu2 %v138_v33, %s168_s10  ;;  %159 = vst.msk [vmem:[%s260_s1 + $0x8] sm:$0xff] %vm70_vm1, %v77_v40  }
  0x6d   :  { %v130_v39 = vpop.permute.xlu2 %129  }
  0x76   :  { %v140_v41 = vpop.permute.xlu2 %139  }
  0x84   :  { %v88_v42 = vpop.permute.xlu0 %87   ;;  %v109_v43 = vpop.permute.xlu1 %108  }
  0x85   :  { %90 = vst.msk [vmem:[%s260_s1] sm:$0xff] %vm89_vm2, %v88_v42  }
  0x86   :  { %111 = vst.msk [vmem:[%s260_s1] sm:$0xff] %vm110_vm3, %v109_v43  }
  0x87   :  { %132 = vst.msk [vmem:[%s260_s1] sm:$0xff] %vm131_vm4, %v130_v39  }
  0x8d   :  { %v98_v44 = vpop.permute.xlu0 %97   ;;  %v119_v45 = vpop.permute.xlu1 %118  }
  0x8e   :  { %160 = vst.msk [vmem:[%s260_s1 + $0x8] sm:$0xff] %vm89_vm2, %v98_v44  }
  0x8f   :  { %161 = vst.msk [vmem:[%s260_s1 + $0x8] sm:$0xff] %vm110_vm3, %v119_v45  }
  0x90   :  { %162 = vst.msk [vmem:[%s260_s1 + $0x8] sm:$0xff] %vm131_vm4, %v140_v41  }

// kernel: encoder_forward.1
= control target key start
LH: loop header
LB: loop body
LE: loop exit
PB: predicated region body
PF: predicated region fallthrough
CT: control target
= control target key end

     0   :  { %s2234_s0 = inlined_call_operand.vmem [shape: f32[16,32], index: 0, kind: input, shape index: {}]   ;;  %s2235_s1 = inlined_call_operand.vmem [shape: f32[16,64], index: 1, kind: input, shape index: {}]   ;;  %s2236_s2 = inlined_call_operand.vmem [shape: f32[64,32], index: 2, kind: input, shape index: {}]   ;;  %s2237_s3 = inlined_call_operand.vmem [shape: f32[64,64], index: 3, kind: input, shape index: {}]   ;;  %s2238_s4 = inlined_call_operand.vmem [shape: f32[2,32,32], index: 4, kind: input, shape index: {}]   ;;  %s2239_s5 = inlined_call_operand.vmem [shape: f32[2,32,32], index: 5, kind: input, shape index: {}]   ;;  %s2240_s6 = inlined_call_operand.vmem [shape: f32[2,32,32], index: 6, kind: input, shape index: {}]   ;;  %s2241_s7 = inlined_call_operand.vmem [shape: f32[2,32,32], index: 7, kind: input, shape index: {}]   ;;  %s2242_s8 = inlined_call_operand.vmem [shape: f32[2,1,32], index: 8, kind: input, shape index: {}]   ;;  %s2243_s9 = inlined_call_operand.vmem [shape: f32[2,1,32], index: 9, kind: input, shape index: {}]   ;;  %s2244_s10 = inlined_call_operand.vmem [shape: f32[2,1,32], index: 10, kind: input, shape index: {}]   ;;  %s2245_s11 = inlined_call_operand.vmem [shape: f32[2,1,32], index: 11, kind: input, shape index: {}]   ;;  %s2246_s12 = inlined_call_operand.vmem [shape: f32[2,32,64], index: 12, kind: input, shape index: {}]   ;;  %s2247_s13 = inlined_call_operand.vmem [shape: f32[2,1,64], index: 13, kind: input, shape index: {}]   ;;  %s2248_s14 = inlined_call_operand.vmem [shape: f32[2,64,32], index: 14, kind: input, shape index: {}]   ;;  %s2249_s15 = inlined_call_operand.vmem [shape: f32[2,1,32], index: 15, kind: input, shape index: {}]   ;;  %s2250_s16 = inlined_call_operand.vmem [shape: f32[4,1,32], index: 16, kind: input, shape index: {}]   ;;  %s2251_s17 = inlined_call_operand.vmem [shape: f32[4,1,32], index: 17, kind: input, shape index: {}]   ;;  %s2252_s18 = inlined_call_operand.vmem [shape: f32[1,32], index: 18, kind: input, shape index: {}]   ;;  %s2253_s19 = inlined_call_operand.vmem [shape: f32[1,32], index: 19, kind: input, shape index: {}]   ;;  %s2254_s20 = inlined_call_operand.hbm [shape: f32[16,32], index: 20, kind: output, shape index: {}]  }
   0x1   :  { %2260 = sst [smem:[#allocation5_spill]] %s2234_s0 }
   0x2   :  { %2261 = sst [smem:[#allocation6_spill]] %s2235_s1 }
   0x3   :  { %2262 = sst [smem:[#allocation7_spill]] %s2236_s2 }
   0x4   :  { %2263 = sst [smem:[#allocation8_spill]] %s2237_s3 }
   0x5   :  { %2264 = sst [smem:[#allocation9_spill]] %s2238_s4 }
   0x6   :  { %s2265_s23 = sld [smem:[#allocation5_spill]]  ;;  %vm88_vm0 = vcmask 261120  }
   0xc   :  { %v1677_v0 = vld [vmem:[%s2265_s23] sm:$0xff]  ;;  %v1682_v1 = vld [vmem:[%s2265_s23 + $0x8] sm:$0xff] }
   0xd   :  { %v89_v2 = vsel %vm88_vm0, %v1677_v0, 0.0  ;;  %v92_v3 = vsel %vm88_vm0, %v1682_v1, 0.0 }
   0xe   :  { %90 = vadd.xlane.f32.xlu0 %v89_v2 }
   0xf   :  { %25 = vsyncpa [#allocation3], 0  ;;  %v1565_v4 = vmov 32.0   ;;  %s2266_s26 = sld [smem:[#allocation9_spill]]  ;;  %v222_v22 = vld [vmem:[%s2239_s5 + $0x18] sm:$0xff]  ;;  %v221_v25 = vld [vmem:[%s2239_s5 + $0x10] sm:$0xff] }
  0x10   :  { %1481 = vrcp.f32 %v1565_v4  ;;  %v253_v23 = vld [vmem:[%s2240_s6 + $0x18] sm:$0xff]  ;;  %239 = vmatpush.msra.mxu1 %v222_v22  ;;  %v252_v26 = vld [vmem:[%s2240_s6 + $0x10] sm:$0xff]  ;;  %v220_v28 = vld [vmem:[%s2239_s5 + $0x8] sm:$0xff]  ;;  %s2267_s4 = sld [smem:[#allocation7_spill]]  ;;  %vm354_vm14 = vcmask 523264  }
  0x11   :  { %270 = vmatpush.msra.mxu2 %v253_v23  ;;  %v251_v29 = vld [vmem:[%s2240_s6 + $0x8] sm:$0xff]  ;;  %v219_v32 = vld [vmem:[%s2239_s5] sm:$0xff]  ;;  %s2268_s23 = sld [smem:[#allocation8_spill]] }
  0x12   :  { %240 = vmatpush.msra.mxu1 %v221_v25  ;;  %v250_v34 = vld [vmem:[%s2240_s6] sm:$0xff]  ;;  %s2269_s29 = sld [smem:[#allocation6_spill]] }
  0x13   :  { %271 = vmatpush.msra.mxu2 %v252_v26  ;;  %v1459_v63 = vld [vmem:[%s2250_s16] ss:$0 sm:$0xff] }
  0x14   :  { %241 = vmatpush.msra.mxu1 %v220_v28  ;;  %v1462_v28 = vld [vmem:[%s2243_s9] ss:$0 sm:$0xff] }
  0x15   :  { %v185_v21 = vld [vmem:[%s2266_s26 + $0x18] sm:$0xff]  ;;  %v184_v24 = vld [vmem:[%s2266_s26 + $0x10] sm:$0xff]  ;;  %v183_v27 = vld [vmem:[%s2266_s26 + $0x8] sm:$0xff]  ;;  %272 = vmatpush.msra.mxu2 %v251_v29 }
  0x16   :  { %93 = vadd.xlane.f32.xlu0 %v92_v3  ;;  %v1482_v5 = vpop.eup %1481  ;;  %208 = vmatpush.msra.mxu0 %v185_v21  ;;  %v182_v31 = vld [vmem:[%s2266_s26] sm:$0xff] }
  0x17   :  { %v96_v6 = vmul.f32 32.0, %v1482_v5  ;;  %vm100_vm1 = vweird.f32 %v1482_v5  ;;  %242 = vmatpush.msra.mxu1 %v219_v32  ;;  %273 = vmatpush.msra.mxu2 %v250_v34  ;;  %v1463_v34 = vld [vmem:[%s2244_s10] ss:$0 sm:$0xff] }
  0x18   :  { %209 = vmatpush.msra.mxu0 %v184_v24 }
  0x19   :  { %v97_v7 = vsub.f32 1.0, %v96_v6 }
  0x1a   :  { %210 = vmatpush.msra.mxu0 %v183_v27 }
  0x1b   :  { %v98_v8 = vmul.f32 %v1482_v5, %v97_v7 }
  0x1c   :  { %211 = vmatpush.msra.mxu0 %v182_v31 }
  0x1d   :  { %v99_v9 = vadd.f32 %v1482_v5, %v98_v8 }
  0x1f   :  { %v1688_v10 = vsel %vm100_vm1, %v1482_v5, %v99_v9  ;;  %v1460_v9 = vld [vmem:[%s2251_s17] ss:$0 sm:$0xff] }
  0x81   :  { %v91_v11 = vpop.xlane.xlu0 %90 }
  0x82   :  { %v102_v12 = vmul.f32 %v1688_v10, %v91_v11 }
  0x84   :  { %v1692_v13 = vsub.f32 %v1677_v0, %v102_v12 }
  0x86   :  { %v106_v14 = vmul.f32 %v1692_v13, %v1692_v13  ;;  %v173_v7 = vmul.f32 %v1459_v63, %v1692_v13 }
  0x88   :  { %v108_v15 = vsel %vm88_vm0, %v106_v14, 0.0 }
  0x89   :  { %109 = vadd.xlane.f32.xlu1 %v108_v15  ;;  %v94_v16 = vpop.xlane.xlu0 %93 }
  0x8a   :  { %v103_v17 = vmul.f32 %v1688_v10, %v94_v16 }
  0x8c   :  { %v1699_v18 = vsub.f32 %v1682_v1, %v103_v17 }
  0x8e   :  { %v107_v19 = vmul.f32 %v1699_v18, %v1699_v18  ;;  %v174_v22 = vmul.f32 %v1459_v63, %v1699_v18  ;;  %v1760_v18 = vld [vmem:[%s2267_s4 + $0x38] sm:$0xff] }
  0x90   :  { %v111_v20 = vsel %vm88_vm0, %v107_v19, 0.0 }
  0x91   :  { %112 = vadd.xlane.f32.xlu1 %v111_v20 }
  0xfc   :  { %v110_v30 = vpop.xlane.xlu1 %109 }
  0xfd   :  { %v114_v33 = vmul.f32 0.032258064, %v110_v30 }
  0xff   :  { %1483 = vrsqrt.f32 %v114_v33  ;;  %vm123_vm2 = vcmp.eq.f32.partialorder %v114_v33, inf  ;;  %v126_v47 = vand.u32 2147483648, %v114_v33  ;;  %vm125_vm3 = vcmp.eq.f32.partialorder %v114_v33, 0.0 }
 0x104   :  { %v113_v35 = vpop.xlane.xlu1 %112 }
 0x105   :  { %v1484_v36 = vpop.eup %1483  ;;  %v115_v37 = vmul.f32 0.032258064, %v113_v35  ;;  %v1769_v35 = vld [vmem:[%s2267_s4 + $0x30] sm:$0xff] }
 0x106   :  { %v117_v38 = vmul.f32 %v1484_v36, %v114_v33 }
 0x107   :  { %1485 = vrsqrt.f32 %v115_v37  ;;  %vm135_vm4 = vcmp.eq.f32.partialorder %v115_v37, inf  ;;  %v138_v55 = vand.u32 2147483648, %v115_v37  ;;  %vm137_vm5 = vcmp.eq.f32.partialorder %v115_v37, 0.0 }
 0x108   :  { %v118_v39 = vmul.f32 %v1484_v36, %v117_v38 }
 0x10a   :  { %v119_v40 = vmul.f32 0.5, %v118_v39 }
 0x10c   :  { %v120_v41 = vsub.f32 1.5, %v119_v40  ;;  %v1776_v40 = vld [vmem:[%s2267_s4 + $0x28] sm:$0xff] }
 0x10d   :  { %v1486_v42 = vpop.eup %1485 }
 0x10e   :  { %v121_v43 = vmul.f32 %v1484_v36, %v120_v41  ;;  %v129_v44 = vmul.f32 %v1486_v42, %v115_v37 }
 0x110   :  { %v122_v45 = vmul.f32 %v121_v43, %v114_v33  ;;  %v130_v46 = vmul.f32 %v1486_v42, %v129_v44  ;;  %v1785_v44 = vld [vmem:[%s2267_s4 + $0x20] sm:$0xff] }
 0x112   :  { %v131_v48 = vmul.f32 0.5, %v130_v46  ;;  %v124_v49 = vsel %vm123_vm2, %v114_v33, %v122_v45 }
 0x113   :  { %v127_v50 = vsel %vm125_vm3, %v126_v47, %v124_v49 }
 0x114   :  { %v132_v51 = vsub.f32 1.5, %v131_v48  ;;  %v140_v52 = vadd.f32 1e-06, %v127_v50  ;;  %v1794_v48 = vld [vmem:[%s2267_s4 + $0x18] sm:$0xff] }
 0x116   :  { %v133_v53 = vmul.f32 %v1486_v42, %v132_v51  ;;  %1487 = vrcp.f32 %v140_v52  ;;  %v153_v62 = vand.u32 2147483648, %v140_v52  ;;  %v151_v3 = vand.u32 2147483647, %v140_v52  ;;  %v1802_v51 = vld [vmem:[%s2267_s4 + $0x10] sm:$0xff] }
 0x117   :  { %vm147_vm7 = vweird.f32 %v140_v52 }
 0x118   :  { %v134_v54 = vmul.f32 %v133_v53, %v115_v37  ;;  %v154_v6 = vor.u32 1.1754944e-38, %v153_v62  ;;  %vm152_vm9 = vcmp.eq.f32.partialorder %v151_v3, 8.507059e+37  ;;  %v1809_v53 = vld [vmem:[%s2267_s4 + $0x8] sm:$0xff]  ;;  %v1832_v3 = vld [vmem:[%s2268_s23 + $0x38] sm:$0xff] }
 0x119   :  { %381 = vmatpush.msrb.mxu0 %v1832_v3 }
 0x11a   :  { %v136_v56 = vsel %vm135_vm4, %v115_v37, %v134_v54 }
 0x11b   :  { %v139_v57 = vsel %vm137_vm5, %v138_v55, %v136_v56  ;;  %v1816_v56 = vld [vmem:[%s2267_s4] sm:$0xff] }
 0x11c   :  { %v1488_v58 = vpop.eup %1487  ;;  %v141_v59 = vadd.f32 1e-06, %v139_v57 }
 0x11d   :  { %v143_v60 = vmul.f32 %v1488_v58, %v140_v52  ;;  %vm148_vm6 = vweird.f32 %v1488_v58 }
 0x11e   :  { %1489 = vrcp.f32 %v141_v59  ;;  %vm149_vm8 = vmor %vm147_vm7, %vm148_vm6  ;;  %v167_v16 = vand.u32 2147483648, %v141_v59  ;;  %v165_v20 = vand.u32 2147483647, %v141_v59  ;;  %vm161_vm11 = vweird.f32 %v141_v59 }
 0x11f   :  { %v144_v61 = vsub.f32 1.0, %v143_v60  ;;  %v1461_v60 = vld [vmem:[%s2242_s8] ss:$0 sm:$0xff] }
 0x120   :  { %v168_v21 = vor.u32 1.1754944e-38, %v167_v16  ;;  %vm166_vm13 = vcmp.eq.f32.partialorder %v165_v20, 8.507059e+37  ;;  %v1870_v20 = vld [vmem:[%s2268_s23 + $0x18] sm:$0xff] }
 0x121   :  { %v145_v2 = vmul.f32 %v1488_v58, %v144_v61 }
 0x123   :  { %v146_v4 = vadd.f32 %v1488_v58, %v145_v2 }
 0x124   :  { %v1490_v5 = vpop.eup %1489 }
 0x125   :  { %v150_v8 = vsel %vm149_vm8, %v1488_v58, %v146_v4  ;;  %v157_v11 = vmul.f32 %v1490_v5, %v141_v59  ;;  %vm162_vm10 = vweird.f32 %v1490_v5  ;;  %v1837_v4 = vld [vmem:[%s2268_s23 + $0x30] sm:$0xff] }
 0x126   :  { %v155_v12 = vsel %vm152_vm9, %v154_v6, %v150_v8  ;;  %vm163_vm12 = vmor %vm161_vm11, %vm162_vm10  ;;  %382 = vmatpush.msrb.mxu0 %v1837_v4 }
 0x127   :  { %v175_v14 = vmul.f32 %v173_v7, %v155_v12  ;;  %v158_v15 = vsub.f32 1.0, %v157_v11  ;;  %v1850_v7 = vld [vmem:[%s2269_s29] sm:$0xff] }
 0x129   :  { %v180_v17 = vadd.f32 %v1460_v9, %v175_v14  ;;  %v159_v19 = vmul.f32 %v1490_v5, %v158_v15  ;;  %v1857_v14 = vld [vmem:[%s2269_s29 + $0x8] sm:$0xff]  ;;  %s1351_s29 = sshll.u32 %s2254_s20, 4  ;;  %s1352_s29 = int_to_ptr.hbm [resolvable:$true] %s1351_s29 }
 0x12b   :  { %1363 = vmatmul.msk.f32.vlgmr.msra.gmra.mxu0 %vm88_vm0, %v180_v17  ;;  %1365 = vmatmul.msk.f32.vlgmr.msra.gmra.mxu1 %vm88_vm0, %v180_v17  ;;  %v160_v13 = vadd.f32 %v1490_v5, %v159_v19  ;;  %v1864_v19 = vld [vmem:[%s2268_s23 + $0x20] sm:$0xff] }
 0x12c   :  { %1367 = vmatmul.msk.f32.vlgmr.msra.gmra.mxu2 %vm88_vm0, %v180_v17 }
 0x12d   :  { %v164_v23 = vsel %vm163_vm12, %v1490_v5, %v160_v13  ;;  %v1843_v5 = vld [vmem:[%s2268_s23 + $0x28] sm:$0xff]  ;;  %v1875_v13 = vld [vmem:[%s2268_s23 + $0x10] sm:$0xff] }
 0x12e   :  { %v169_v24 = vsel %vm166_vm13, %v168_v21, %v164_v23  ;;  %383 = vmatpush.msrb.mxu0 %v1843_v5  ;;  %v1881_v21 = vld [vmem:[%s2268_s23 + $0x8] sm:$0xff] }
 0x12f   :  { %v176_v25 = vmul.f32 %v174_v22, %v169_v24  ;;  %v1888_v22 = vld [vmem:[%s2268_s23] sm:$0xff] }
 0x130   :  { %384 = vmatpush.msrb.mxu0 %v1864_v19 }
 0x131   :  { %v181_v26 = vadd.f32 %v1460_v9, %v176_v25 }
 0x132   :  { %385 = vmatpush.msrb.mxu0 %v1870_v20 }
 0x133   :  { %1364 = vmatmul.msk.f32.gmra.mxu0 %vm88_vm0, %v181_v26  ;;  %1366 = vmatmul.msk.f32.gmra.mxu1 %vm88_vm0, %v181_v26 }
 0x134   :  { %1368 = vmatmul.msk.f32.gmra.mxu2 %vm88_vm0, %v181_v26  ;;  %386 = vmatpush.msrb.mxu0 %v1875_v13 }
 0x136   :  { %387 = vmatpush.msrb.mxu0 %v1881_v21 }
 0x138   :  { %388 = vmatpush.msrb.mxu0 %v1888_v22 }
 0x1a8   :  { %v244_v27 = vpop.f32.mrf.mxu1  ;;  %v213_v59 = vpop.f32.mrf.mxu0 }
 0x1a9   :  { %v245_v32 = vadd.f32 %v1462_v28, %v244_v27  ;;  %v214_v62 = vadd.f32 %v1461_v60, %v213_v59 }
 0x1ab   :  { %v287_v37 = vmul.f32 %v245_v32, %v1769_v35  ;;  %v285_v46 = vmul.f32 %v245_v32, %v1785_v44  ;;  %v283_v55 = vmul.f32 %v245_v32, %v1802_v51  ;;  %v281_v61 = vmul.f32 %v245_v32, %v1816_v56  ;;  %v457_v32 = vld [vmem:[%s2241_s7 + $0x10] sm:$0xff] }
 0x1af   :  { %v275_v29 = vpop.f32.mrf.mxu2 }
 0x1b0   :  { %v247_v30 = vpop.f32.mrf.mxu1  ;;  %v276_v38 = vadd.f32 %v1463_v34, %v275_v29  ;;  %v216_v63 = vpop.f32.mrf.mxu0 }
 0x1b1   :  { %v248_v31 = vadd.f32 %v1462_v28, %v247_v30  ;;  %v217_v2 = vadd.f32 %v1461_v60, %v216_v63 }
 0x1b2   :  { %v295_v43 = vmul.f32 %v276_v38, %v1769_v35  ;;  %v293_v47 = vmul.f32 %v276_v38, %v1785_v44  ;;  %v291_v52 = vmul.f32 %v276_v38, %v1802_v51  ;;  %v289_v57 = vmul.f32 %v276_v38, %v1816_v56 }
 0x1b3   :  { %v288_v33 = vmul.f32 %v248_v31, %v1760_v18  ;;  %v286_v42 = vmul.f32 %v248_v31, %v1776_v40  ;;  %v284_v50 = vmul.f32 %v248_v31, %v1794_v48  ;;  %v282_v58 = vmul.f32 %v248_v31, %v1809_v53  ;;  %v458_v31 = vld [vmem:[%s2241_s7 + $0x18] sm:$0xff] }
 0x1b4   :  { %481 = vmatpush.msrb.mxu2 %v458_v31 }
 0x1b5   :  { %1369 = vmatpush.xpose.msk.msra.mxu3 %vm88_vm0, %v288_v33  ;;  %v456_v33 = vld [vmem:[%s2241_s7 + $0x8] sm:$0xff] }
 0x1b6   :  { %482 = vmatpush.msrb.mxu2 %v457_v32 }
 0x1b7   :  { %v278_v36 = vpop.f32.mrf.mxu2 }
 0x1b8   :  { %v279_v39 = vadd.f32 %v1463_v34, %v278_v36  ;;  %v455_v36 = vld [vmem:[%s2241_s7] sm:$0xff]  ;;  %483 = vmatpush.msrb.mxu2 %v456_v33 }
 0x1b9   :  { %1370 = vmatpush.xpose.msk.msra.mxu3 %vm88_vm0, %v287_v37 }
 0x1ba   :  { %v296_v41 = vmul.f32 %v279_v39, %v1760_v18  ;;  %v294_v45 = vmul.f32 %v279_v39, %v1776_v40  ;;  %v292_v49 = vmul.f32 %v279_v39, %v1794_v48  ;;  %v290_v54 = vmul.f32 %v279_v39, %v1809_v53  ;;  %484 = vmatpush.msrb.mxu2 %v455_v36  ;;  %v587_v36 = vld [vmem:[%s2246_s12 + $0x18] sm:$0xff] }
 0x1bb   :  { %610 = vmatpush.msra.mxu0 %v587_v36 }
 0x1bc   :  { %440 = vmatpush.msrb.mxu1 %v296_v41 }
 0x1bd   :  { %1371 = vmatpush.xpose.msk.msra.mxu3 %vm88_vm0, %v286_v42 }
 0x1be   :  { %441 = vmatpush.msrb.mxu1 %v295_v43 }
 0x1c0   :  { %442 = vmatpush.msrb.mxu1 %v294_v45 }
 0x1c1   :  { %1372 = vmatpush.xpose.msk.msra.mxu3 %vm88_vm0, %v285_v46 }
 0x1c2   :  { %443 = vmatpush.msrb.mxu1 %v293_v47 }
 0x1c4   :  { %444 = vmatpush.msrb.mxu1 %v292_v49 }
 0x1c5   :  { %1373 = vmatpush.xpose.msk.msra.mxu3 %vm88_vm0, %v284_v50 }
 0x1c6   :  { %445 = vmatpush.msrb.mxu1 %v291_v52 }
 0x1c8   :  { %446 = vmatpush.msrb.mxu1 %v290_v54 }
 0x1c9   :  { %1374 = vmatpush.xpose.msk.msra.mxu3 %vm88_vm0, %v283_v55 }
 0x1ca   :  { %447 = vmatpush.msrb.mxu1 %v289_v57 }
 0x1cd   :  { %1375 = vmatpush.xpose.msk.msra.mxu3 %vm88_vm0, %v282_v58 }
 0x1d1   :  { %1376 = vmatpush.xpose.msk.msra.mxu3 %vm88_vm0, %v281_v61 }
 0x1d4   :  { %1377 = vmatmul.msk.f32.vlgmr.msra.gmra.mxu3 %vm88_vm0, %v214_v62 }
 0x1dc   :  { %1378 = vmatmul.msk.f32.gmra.mxu3 %vm88_vm0, %v217_v2 }
 0x257   :  { %v344_v6 = vpop.f32.mrf.mxu3 }
 0x258   :  { %v350_v8 = vmul.f32 0.35355338, %v344_v6 }
 0x25a   :  { %v352_v9 = vadd.f32 %v350_v8, %v1850_v7 }
 0x25c   :  { %v355_v11 = vsel %vm354_vm14, %v352_v9, -inf }
 0x25d   :  { %356 = vmax.xlane.f32.xlu2 %v355_v11  ;;  %v1464_v11 = vld [vmem:[%s2245_s11] ss:$0 sm:$0xff] }
 0x25f   :  { %v347_v12 = vpop.f32.mrf.mxu3 }
 0x260   :  { %v351_v15 = vmul.f32 0.35355338, %v347_v12 }
 0x262   :  { %v353_v16 = vadd.f32 %v351_v15, %v1857_v14 }
 0x264   :  { %v358_v17 = vsel %vm354_vm14, %v353_v16, -inf }
 0x265   :  { %359 = vmax.xlane.f32.xlu2 %v358_v17 }
 0x2d0   :  { %v357_v23 = vpop.xlane.xlu2 %356 }
 0x2d1   :  { %v361_v24 = vsub.f32 %v352_v9, %v357_v23 }
 0x2d3   :  { %v363_v25 = vmul.f32 1.442695, %v361_v24 }
 0x2d5   :  { %1491 = vpow2.f32 %v363_v25 }
 0x2d8   :  { %v360_v26 = vpop.xlane.xlu2 %359 }
 0x2d9   :  { %v362_v27 = vsub.f32 %v353_v16, %v360_v26 }
 0x2db   :  { %v1492_v28 = vpop.eup %1491  ;;  %v365_v29 = vmul.f32 1.442695, %v362_v27 }
 0x2dc   :  { %1379 = vmatmul.msk.f32.vlgmr.msrb.gmra.mxu0 %vm354_vm14, %v1492_v28 }
 0x2dd   :  { %1493 = vpow2.f32 %v365_v29 }
 0x2e3   :  { %v1494_v30 = vpop.eup %1493 }
 0x2e4   :  { %1380 = vmatmul.msk.f32.gmra.mxu0 %vm354_vm14, %v1494_v30 }
 0x359   :  { %v390_v34 = vpop.f32.mrf.mxu0 }
 0x35a   :  { %1495 = vrcp.f32 %v390_v34  ;;  %v407_v42 = vand.u32 2147483648, %v390_v34  ;;  %v405_v45 = vand.u32 2147483647, %v390_v34  ;;  %vm401_vm1 = vweird.f32 %v390_v34 }
 0x35c   :  { %v408_v49 = vor.u32 1.1754944e-38, %v407_v42  ;;  %vm406_vm3 = vcmp.eq.f32.partialorder %v405_v45, 8.507059e+37 }
 0x360   :  { %v1496_v37 = vpop.eup %1495 }
 0x361   :  { %v397_v38 = vmul.f32 %v1496_v37, %v390_v34  ;;  %v393_v39 = vpop.f32.mrf.mxu0  ;;  %vm402_vm15 = vweird.f32 %v1496_v37 }
 0x362   :  { %1497 = vrcp.f32 %v393_v39  ;;  %vm403_vm2 = vmor %vm401_vm1, %vm402_vm15  ;;  %v421_v58 = vand.u32 2147483648, %v393_v39  ;;  %v419_v60 = vand.u32 2147483647, %v393_v39  ;;  %vm415_vm5 = vweird.f32 %v393_v39 }
 0x363   :  { %v398_v41 = vsub.f32 1.0, %v397_v38  ;;  %v585_v38 = vld [vmem:[%s2246_s12 + $0x8] sm:$0xff] }
 0x364   :  { %v422_v62 = vor.u32 1.1754944e-38, %v421_v58  ;;  %vm420_vm7 = vcmp.eq.f32.partialorder %v419_v60, 8.507059e+37 }
 0x365   :  { %v399_v43 = vmul.f32 %v1496_v37, %v398_v41  ;;  %v584_v41 = vld [vmem:[%s2246_s12] sm:$0xff] }
 0x367   :  { %v400_v46 = vadd.f32 %v1496_v37, %v399_v43 }
 0x368   :  { %v1498_v47 = vpop.eup %1497 }
 0x369   :  { %v411_v50 = vmul.f32 %v1498_v47, %v393_v39  ;;  %v404_v52 = vsel %vm403_vm2, %v1496_v37, %v400_v46  ;;  %vm416_vm4 = vweird.f32 %v1498_v47  ;;  %v586_v37 = vld [vmem:[%s2246_s12 + $0x10] sm:$0xff] }
 0x36a   :  { %v409_v54 = vsel %vm406_vm3, %v408_v49, %v404_v52  ;;  %vm417_vm6 = vmor %vm415_vm5, %vm416_vm4  ;;  %611 = vmatpush.msra.mxu0 %v586_v37 }
 0x36b   :  { %v412_v55 = vsub.f32 1.0, %v411_v50  ;;  %v424_v57 = vmul.f32 %v1492_v28, %v409_v54 }
 0x36c   :  { %612 = vmatpush.msra.mxu0 %v585_v38 }
 0x36d   :  { %v413_v59 = vmul.f32 %v1498_v47, %v412_v55  ;;  %1381 = vmatmul.msk.f32.vlgmr.msrb.gmra.mxu1 %vm354_vm14, %v424_v57 }
 0x36e   :  { %613 = vmatpush.msra.mxu0 %v584_v41 }
 0x36f   :  { %v414_v61 = vadd.f32 %v1498_v47, %v413_v59 }
 0x371   :  { %v418_v63 = vsel %vm417_vm6, %v1498_v47, %v414_v61 }
 0x372   :  { %v423_v2 = vsel %vm420_vm7, %v422_v62, %v418_v63 }
 0x373   :  { %v425_v6 = vmul.f32 %v1494_v30, %v423_v2  ;;  %v630_v2 = vld [vmem:[%s2248_s14 + $0x38] sm:$0xff] }
 0x374   :  { %645 = vmatpush.msra.mxu1 %v630_v2  ;;  %v624_v2 = vld [vmem:[%s2248_s14 + $0x8] sm:$0xff] }
 0x375   :  { %1382 = vmatmul.msk.f32.gmra.mxu1 %vm354_vm14, %v425_v6  ;;  %v629_v6 = vld [vmem:[%s2248_s14 + $0x30] sm:$0xff] }
 0x376   :  { %646 = vmatpush.msra.mxu1 %v629_v6  ;;  %v623_v6 = vld [vmem:[%s2248_s14] sm:$0xff] }
 0x3ea   :  { %v449_v8 = vpop.f32.mrf.mxu1 }
 0x3eb   :  { %1383 = vmatmul.msk.f32.vlgmr.msrb.gmra.mxu2 %vm88_vm0, %v449_v8 }
 0x3f2   :  { %v452_v9 = vpop.f32.mrf.mxu1 }
 0x3f3   :  { %1384 = vmatmul.msk.f32.gmra.mxu2 %vm88_vm0, %v452_v9 }
 0x46e   :  { %v486_v12 = vpop.f32.mrf.mxu2 }
 0x46f   :  { %v487_v15 = vadd.f32 %v1464_v11, %v486_v12 }
 0x471   :  { %v1913_v16 = vadd.f32 %v487_v15, %v1677_v0  ;;  %v627_v15 = vld [vmem:[%s2248_s14 + $0x20] sm:$0xff] }
 0x473   :  { %v498_v17 = vsel %vm88_vm0, %v1913_v16, 0.0 }
 0x474   :  { %499 = vadd.xlane.f32.xlu0 %v498_v17 }
 0x476   :  { %v489_v23 = vpop.f32.mrf.mxu2 }
 0x477   :  { %v490_v24 = vadd.f32 %v1464_v11, %v489_v23  ;;  %v628_v11 = vld [vmem:[%s2248_s14 + $0x28] sm:$0xff] }
 0x478   :  { %647 = vmatpush.msra.mxu1 %v628_v11 }
 0x479   :  { %v1918_v25 = vadd.f32 %v490_v24, %v1682_v1  ;;  %v626_v24 = vld [vmem:[%s2248_s14 + $0x18] sm:$0xff] }
 0x47a   :  { %648 = vmatpush.msra.mxu1 %v627_v15 }
 0x47b   :  { %v501_v26 = vsel %vm88_vm0, %v1918_v25, 0.0 }
 0x47c   :  { %502 = vadd.xlane.f32.xlu1 %v501_v26  ;;  %649 = vmatpush.msra.mxu1 %v626_v24 }
 0x4e7   :  { %v500_v27 = vpop.xlane.xlu0 %499 }
 0x4e8   :  { %v504_v28 = vmul.f32 %v500_v27, %v1688_v10 }
 0x4ea   :  { %v1924_v29 = vsub.f32 %v1913_v16, %v504_v28  ;;  %v625_v28 = vld [vmem:[%s2248_s14 + $0x10] sm:$0xff] }
 0x4eb   :  { %650 = vmatpush.msra.mxu1 %v625_v28 }
 0x4ec   :  { %v508_v0 = vmul.f32 %v1924_v29, %v1924_v29 }
 0x4ed   :  { %651 = vmatpush.msra.mxu1 %v624_v2 }
 0x4ee   :  { %v510_v30 = vsel %vm88_vm0, %v508_v0, 0.0 }
 0x4ef   :  { %511 = vadd.xlane.f32.xlu2 %v510_v30  ;;  %v503_v31 = vpop.xlane.xlu1 %502  ;;  %652 = vmatpush.msra.mxu1 %v623_v6 }
 0x4f0   :  { %v505_v1 = vmul.f32 %v503_v31, %v1688_v10 }
 0x4f2   :  { %v1931_v32 = vsub.f32 %v1918_v25, %v505_v1 }
 0x4f4   :  { %v509_v33 = vmul.f32 %v1931_v32, %v1931_v32 }
 0x4f6   :  { %v513_v34 = vsel %vm88_vm0, %v509_v33, 0.0 }
 0x4f7   :  { %514 = vadd.xlane.f32.xlu0 %v513_v34  ;;  %v1465_v34 = vld [vmem:[%s2250_s16 + $0x1] ss:$0 sm:$0xff] }
 0x562   :  { %v512_v39 = vpop.xlane.xlu2 %511 }
 0x563   :  { %v516_v42 = vmul.f32 0.032258064, %v512_v39 }
 0x565   :  { %1499 = vrsqrt.f32 %v516_v42  ;;  %vm525_vm8 = vcmp.eq.f32.partialorder %v516_v42, inf  ;;  %v528_v60 = vand.u32 2147483648, %v516_v42  ;;  %vm527_vm9 = vcmp.eq.f32.partialorder %v516_v42, 0.0 }
 0x56a   :  { %v515_v43 = vpop.xlane.xlu0 %514 }
 0x56b   :  { %v1500_v45 = vpop.eup %1499  ;;  %v517_v46 = vmul.f32 0.032258064, %v515_v43 }
 0x56c   :  { %v519_v47 = vmul.f32 %v1500_v45, %v516_v42 }
 0x56d   :  { %1501 = vrsqrt.f32 %v517_v46  ;;  %vm537_vm10 = vcmp.eq.f32.partialorder %v517_v46, inf  ;;  %v540_v23 = vand.u32 2147483648, %v517_v46  ;;  %vm539_vm11 = vcmp.eq.f32.partialorder %v517_v46, 0.0 }
 0x56e   :  { %v520_v49 = vmul.f32 %v1500_v45, %v519_v47 }
 0x570   :  { %v521_v50 = vmul.f32 0.5, %v520_v49 }
 0x572   :  { %v522_v52 = vsub.f32 1.5, %v521_v50 }
 0x573   :  { %v1502_v54 = vpop.eup %1501 }
 0x574   :  { %v523_v55 = vmul.f32 %v1500_v45, %v522_v52  ;;  %v531_v57 = vmul.f32 %v1502_v54, %v517_v46  ;;  %v1466_v45 = vld [vmem:[%s2251_s17 + $0x1] ss:$0 sm:$0xff] }
 0x576   :  { %v524_v58 = vmul.f32 %v523_v55, %v516_v42  ;;  %v532_v59 = vmul.f32 %v1502_v54, %v531_v57 }
 0x578   :  { %v526_v61 = vsel %vm525_vm8, %v516_v42, %v524_v58  ;;  %v533_v62 = vmul.f32 0.5, %v532_v59  ;;  %v575_v42 = vmul.f32 %v1465_v34, %v1924_v29  ;;  %v576_v59 = vmul.f32 %v1465_v34, %v1931_v32  ;;  %v1467_v32 = vld [vmem:[%s2247_s13] ss:$0 sm:$0xff] }
 0x579   :  { %v529_v63 = vsel %vm527_vm9, %v528_v60, %v526_v61 }
 0x57a   :  { %v542_v8 = vadd.f32 1e-06, %v529_v63  ;;  %v534_v9 = vsub.f32 1.5, %v533_v62 }
 0x57c   :  { %1503 = vrcp.f32 %v542_v8  ;;  %v535_v12 = vmul.f32 %v1502_v54, %v534_v9  ;;  %v555_v33 = vand.u32 2147483648, %v542_v8  ;;  %v553_v37 = vand.u32 2147483647, %v542_v8 }
 0x57d   :  { %vm549_vm13 = vweird.f32 %v542_v8 }
 0x57e   :  { %v536_v17 = vmul.f32 %v535_v12, %v517_v46  ;;  %v556_v41 = vor.u32 1.1754944e-38, %v555_v33  ;;  %vm554_vm1 = vcmp.eq.f32.partialorder %v553_v37, 8.507059e+37 }
 0x580   :  { %v538_v26 = vsel %vm537_vm10, %v517_v46, %v536_v17 }
 0x581   :  { %v541_v27 = vsel %vm539_vm11, %v540_v23, %v538_v26  ;;  %v1468_v23 = vld [vmem:[%s2249_s15] ss:$0 sm:$0xff] }
 0x582   :  { %v1504_v0 = vpop.eup %1503  ;;  %v543_v30 = vadd.f32 1e-06, %v541_v27 }
 0x583   :  { %v545_v31 = vmul.f32 %v1504_v0, %v542_v8  ;;  %vm550_vm12 = vweird.f32 %v1504_v0 }
 0x584   :  { %1505 = vrcp.f32 %v543_v30  ;;  %vm551_vm15 = vmor %vm549_vm13, %vm550_vm12  ;;  %v569_v52 = vand.u32 2147483648, %v543_v30  ;;  %v567_v57 = vand.u32 2147483647, %v543_v30  ;;  %vm563_vm3 = vweird.f32 %v543_v30 }
 0x585   :  { %v546_v1 = vsub.f32 1.0, %v545_v31 }
 0x586   :  { %v570_v29 = vor.u32 1.1754944e-38, %v569_v52  ;;  %vm568_vm5 = vcmp.eq.f32.partialorder %v567_v57, 8.507059e+37  ;;  %v1409_v52 = vld [vmem:[%s2240_s6 + $0x30] sm:$0xff] }
 0x587   :  { %v547_v36 = vmul.f32 %v1504_v0, %v546_v1 }
 0x589   :  { %v548_v38 = vadd.f32 %v1504_v0, %v547_v36 }
 0x58a   :  { %v1506_v39 = vpop.eup %1505 }
 0x58b   :  { %v552_v43 = vsel %vm551_vm15, %v1504_v0, %v548_v38  ;;  %v559_v46 = vmul.f32 %v1506_v39, %v543_v30  ;;  %vm564_vm2 = vweird.f32 %v1506_v39 }
 0x58c   :  { %v557_v47 = vsel %vm554_vm1, %v556_v41, %v552_v43  ;;  %vm565_vm4 = vmor %vm563_vm3, %vm564_vm2  ;;  %v1403_v43 = vld [vmem:[%s2239_s5 + $0x38] sm:$0xff] }
 0x58d   :  { %v577_v49 = vmul.f32 %v575_v42, %v557_v47  ;;  %v560_v50 = vsub.f32 1.0, %v559_v46  ;;  %819 = vmatpush.msrb.mxu3 %v1403_v43  ;;  %v1396_v46 = vld [vmem:[%s2266_s26 + $0x38] sm:$0xff] }
 0x58e   :  { %v1410_v47 = vld [vmem:[%s2240_s6 + $0x38] sm:$0xff]  ;;  %786 = vmatpush.msra.mxu2 %v1396_v46 }
 0x58f   :  { %v582_v54 = vadd.f32 %v1466_v45, %v577_v49  ;;  %v561_v55 = vmul.f32 %v1506_v39, %v560_v50  ;;  %v1395_v49 = vld [vmem:[%s2266_s26 + $0x30] sm:$0xff]  ;;  %v1401_v50 = vld [vmem:[%s2239_s5 + $0x28] sm:$0xff]  ;;  %852 = vmatpush.msrb.mxu0 %v1410_v47 }
 0x590   :  { %787 = vmatpush.msra.mxu2 %v1395_v49 }
 0x591   :  { %1387 = vmatmul.msk.f32.vlgmr.msra.gmra.mxu0 %vm88_vm0, %v582_v54  ;;  %v562_v58 = vadd.f32 %v1506_v39, %v561_v55  ;;  %v1394_v54 = vld [vmem:[%s2266_s26 + $0x28] sm:$0xff] }
 0x592   :  { %v1408_v55 = vld [vmem:[%s2240_s6 + $0x28] sm:$0xff]  ;;  %853 = vmatpush.msrb.mxu0 %v1409_v52  ;;  %788 = vmatpush.msra.mxu2 %v1394_v54 }
 0x593   :  { %v566_v60 = vsel %vm565_vm4, %v1506_v39, %v562_v58  ;;  %v1400_v58 = vld [vmem:[%s2239_s5 + $0x20] sm:$0xff] }
 0x594   :  { %v571_v61 = vsel %vm568_vm5, %v570_v29, %v566_v60  ;;  %v1407_v60 = vld [vmem:[%s2240_s6 + $0x20] sm:$0xff]  ;;  %854 = vmatpush.msrb.mxu0 %v1408_v55 }
 0x595   :  { %v578_v62 = vmul.f32 %v576_v59, %v571_v61  ;;  %v1393_v59 = vld [vmem:[%s2266_s26 + $0x20] sm:$0xff] }
 0x596   :  { %789 = vmatpush.msra.mxu2 %v1393_v59  ;;  %855 = vmatpush.msrb.mxu0 %v1407_v60 }
 0x597   :  { %v583_v63 = vadd.f32 %v1466_v45, %v578_v62  ;;  %v1402_v45 = vld [vmem:[%s2239_s5 + $0x30] sm:$0xff] }
 0x598   :  { %820 = vmatpush.msrb.mxu3 %v1402_v45  ;;  %962 = vmatpush.msrb.mxu2 %v1832_v3  ;;  %v1470_v45 = vld [vmem:[%s2251_s17 + $0x2] ss:$0 sm:$0xff] }
 0x599   :  { %1388 = vmatmul.msk.f32.gmra.mxu0 %vm88_vm0, %v583_v63 }
 0x59a   :  { %821 = vmatpush.msrb.mxu3 %v1401_v50  ;;  %963 = vmatpush.msrb.mxu2 %v1837_v4 }
 0x59c   :  { %822 = vmatpush.msrb.mxu3 %v1400_v58  ;;  %964 = vmatpush.msrb.mxu2 %v1843_v5 }
 0x59e   :  { %965 = vmatpush.msrb.mxu2 %v1864_v19 }
 0x5a0   :  { %966 = vmatpush.msrb.mxu2 %v1870_v20 }
 0x5a2   :  { %967 = vmatpush.msrb.mxu2 %v1875_v13 }
 0x5a4   :  { %968 = vmatpush.msrb.mxu2 %v1881_v21 }
 0x5a6   :  { %969 = vmatpush.msrb.mxu2 %v1888_v22 }
 0x60e   :  { %v615_v8 = vpop.f32.mrf.mxu0 }
 0x60f   :  { %v616_v9 = vadd.f32 %v1467_v32, %v615_v8 }
 0x611   :  { %v621_v11 = vmax.f32 %v616_v9, 0.0 }
 0x613   :  { %1389 = vmatmul.msk.f32.vlgmr.msra.gmra.mxu1 %vm354_vm14, %v621_v11 }
 0x616   :  { %v618_v12 = vpop.f32.mrf.mxu0 }
 0x617   :  { %v619_v15 = vadd.f32 %v1467_v32, %v618_v12 }
 0x619   :  { %v622_v17 = vmax.f32 %v619_v15, 0.0 }
 0x61b   :  { %1390 = vmatmul.msk.f32.gmra.mxu1 %vm354_vm14, %v622_v17 }
 0x690   :  { %v654_v24 = vpop.f32.mrf.mxu1 }
 0x691   :  { %v660_v26 = vadd.f32 %v654_v24, %v1913_v16 }
 0x693   :  { %v1991_v27 = vadd.f32 %v1468_v23, %v660_v26 }
 0x695   :  { %v672_v28 = vsel %vm88_vm0, %v1991_v27, 0.0 }
 0x696   :  { %673 = vadd.xlane.f32.xlu1 %v672_v28 }
 0x698   :  { %v657_v0 = vpop.f32.mrf.mxu1 }
 0x699   :  { %v661_v30 = vadd.f32 %v657_v0, %v1918_v25 }
 0x69b   :  { %v1996_v31 = vadd.f32 %v1468_v23, %v661_v30 }
 0x69d   :  { %v675_v1 = vsel %vm88_vm0, %v1996_v31, 0.0 }
 0x69e   :  { %676 = vadd.xlane.f32.xlu2 %v675_v1 }
 0x709   :  { %v674_v33 = vpop.xlane.xlu1 %673 }
 0x70a   :  { %v678_v34 = vmul.f32 %v674_v33, %v1688_v10 }
 0x70c   :  { %v2002_v16 = vsub.f32 %v1991_v27, %v678_v34  ;;  %v1469_v34 = vld [vmem:[%s2250_s16 + $0x2] ss:$0 sm:$0xff] }
 0x70e   :  { %v682_v36 = vmul.f32 %v2002_v16, %v2002_v16 }
 0x710   :  { %v684_v37 = vsel %vm88_vm0, %v682_v36, 0.0 }
 0x711   :  { %685 = vadd.xlane.f32.xlu0 %v684_v37  ;;  %v677_v38 = vpop.xlane.xlu2 %676 }
 0x712   :  { %v679_v25 = vmul.f32 %v677_v38, %v1688_v10 }
 0x714   :  { %v2009_v39 = vsub.f32 %v1996_v31, %v679_v25 }
 0x716   :  { %v683_v41 = vmul.f32 %v2009_v39, %v2009_v39 }
 0x718   :  { %v687_v42 = vsel %vm88_vm0, %v683_v41, 0.0 }
 0x719   :  { %688 = vadd.xlane.f32.xlu1 %v687_v42  ;;  %v749_v42 = vmul.f32 %v1469_v34, %v2002_v16 }
 0x784   :  { %v686_v57 = vpop.xlane.xlu0 %685 }
 0x785   :  { %v690_v29 = vmul.f32 0.032258064, %v686_v57 }
 0x787   :  { %1507 = vrsqrt.f32 %v690_v29  ;;  %vm699_vm6 = vcmp.eq.f32.partialorder %v690_v29, inf  ;;  %v702_v12 = vand.u32 2147483648, %v690_v29  ;;  %vm701_vm7 = vcmp.eq.f32.partialorder %v690_v29, 0.0 }
 0x78c   :  { %v689_v61 = vpop.xlane.xlu1 %688 }
 0x78d   :  { %v1508_v62 = vpop.eup %1507  ;;  %v691_v63 = vmul.f32 0.032258064, %v689_v61 }
 0x78e   :  { %v693_v2 = vmul.f32 %v1508_v62, %v690_v29 }
 0x78f   :  { %1509 = vrsqrt.f32 %v691_v63  ;;  %vm711_vm8 = vcmp.eq.f32.partialorder %v691_v63, inf  ;;  %v714_v26 = vand.u32 2147483648, %v691_v63  ;;  %vm713_vm9 = vcmp.eq.f32.partialorder %v691_v63, 0.0 }
 0x790   :  { %v694_v6 = vmul.f32 %v1508_v62, %v693_v2  ;;  %v1471_v2 = vld [vmem:[%s2244_s10 + $0x1] ss:$0 sm:$0xff]  ;;  %s1568_s10 = smov 8  }
 0x792   :  { %v695_v32 = vmul.f32 0.5, %v694_v6 }
 0x794   :  { %v696_v8 = vsub.f32 1.5, %v695_v32 }
 0x795   :  { %v1510_v9 = vpop.eup %1509 }
 0x796   :  { %v697_v3 = vmul.f32 %v1508_v62, %v696_v8  ;;  %v705_v4 = vmul.f32 %v1510_v9, %v691_v63 }
 0x798   :  { %v698_v11 = vmul.f32 %v697_v3, %v690_v29  ;;  %v706_v5 = vmul.f32 %v1510_v9, %v705_v4  ;;  %v1473_v3 = vld [vmem:[%s2243_s9 + $0x1] ss:$0 sm:$0xff]  ;;  %s1567_s9 = smov 128  }
 0x79a   :  { %v700_v15 = vsel %vm699_vm6, %v690_v29, %v698_v11  ;;  %v707_v19 = vmul.f32 0.5, %v706_v5  ;;  %v750_v29 = vmul.f32 %v1469_v34, %v2009_v39 }
 0x79b   :  { %v703_v17 = vsel %vm701_vm7, %v702_v12, %v700_v15 }
 0x79c   :  { %v716_v20 = vadd.f32 1e-06, %v703_v17  ;;  %v708_v23 = vsub.f32 1.5, %v707_v19 }
 0x79e   :  { %1511 = vrcp.f32 %v716_v20  ;;  %v709_v13 = vmul.f32 %v1510_v9, %v708_v23  ;;  %v729_v33 = vand.u32 2147483648, %v716_v20  ;;  %v727_v37 = vand.u32 2147483647, %v716_v20 }
 0x79f   :  { %vm723_vm11 = vweird.f32 %v716_v20 }
 0x7a0   :  { %v710_v24 = vmul.f32 %v709_v13, %v691_v63  ;;  %v730_v41 = vor.u32 1.1754944e-38, %v729_v33  ;;  %vm728_vm13 = vcmp.eq.f32.partialorder %v727_v37, 8.507059e+37 }
 0x7a2   :  { %v712_v21 = vsel %vm711_vm8, %v691_v63, %v710_v24 }
 0x7a3   :  { %v715_v28 = vsel %vm713_vm9, %v714_v26, %v712_v21 }
 0x7a4   :  { %v1512_v0 = vpop.eup %1511  ;;  %v717_v22 = vadd.f32 1e-06, %v715_v28 }
 0x7a5   :  { %v719_v30 = vmul.f32 %v1512_v0, %v716_v20  ;;  %vm724_vm10 = vweird.f32 %v1512_v0 }
 0x7a6   :  { %1513 = vrcp.f32 %v717_v22  ;;  %vm725_vm12 = vmor %vm723_vm11, %vm724_vm10  ;;  %v743_v52 = vand.u32 2147483648, %v717_v22  ;;  %v741_v57 = vand.u32 2147483647, %v717_v22  ;;  %vm737_vm1 = vweird.f32 %v717_v22 }
 0x7a7   :  { %v720_v1 = vsub.f32 1.0, %v719_v30 }
 0x7a8   :  { %v744_v58 = vor.u32 1.1754944e-38, %v743_v52  ;;  %vm742_vm3 = vcmp.eq.f32.partialorder %v741_v57, 8.507059e+37 }
 0x7a9   :  { %v721_v36 = vmul.f32 %v1512_v0, %v720_v1 }
 0x7ab   :  { %v722_v38 = vadd.f32 %v1512_v0, %v721_v36 }
 0x7ac   :  { %v1514_v25 = vpop.eup %1513 }
 0x7ad   :  { %v726_v43 = vsel %vm725_vm12, %v1512_v0, %v722_v38  ;;  %v733_v46 = vmul.f32 %v1514_v25, %v717_v22  ;;  %vm738_vm15 = vweird.f32 %v1514_v25  ;;  %v1472_v22 = vld [vmem:[%s2242_s8 + $0x1] ss:$0 sm:$0xff] }
 0x7ae   :  { %v731_v47 = vsel %vm728_vm13, %v730_v41, %v726_v43  ;;  %vm739_vm2 = vmor %vm737_vm1, %vm738_vm15 }
 0x7af   :  { %v751_v49 = vmul.f32 %v749_v42, %v731_v47  ;;  %v734_v50 = vsub.f32 1.0, %v733_v46 }
 0x7b1   :  { %v756_v54 = vadd.f32 %v1470_v45, %v751_v49  ;;  %v735_v55 = vmul.f32 %v1514_v25, %v734_v50  ;;  %v1430_v49 = vld [vmem:[%s2241_s7 + $0x30] sm:$0xff]  ;;  %v1429_v50 = vld [vmem:[%s2241_s7 + $0x28] sm:$0xff] }
 0x7b3   :  { %1398 = vmatmul.msk.f32.vlgmr.msra.gmra.mxu2 %vm88_vm0, %v756_v54  ;;  %1405 = vmatmul.msk.f32.vlgmr.msrb.gmra.mxu3 %vm88_vm0, %v756_v54  ;;  %v736_v16 = vadd.f32 %v1514_v25, %v735_v55 }
 0x7b4   :  { %1412 = vmatmul.msk.f32.vlgmr.msrb.gmra.mxu0 %vm88_vm0, %v756_v54  ;;  %v1428_v54 = vld [vmem:[%s2241_s7 + $0x20] sm:$0xff] }
 0x7b5   :  { %v740_v59 = vsel %vm739_vm2, %v1514_v25, %v736_v16 }
 0x7b6   :  { %v745_v60 = vsel %vm742_vm3, %v744_v58, %v740_v59 }
 0x7b7   :  { %v752_v61 = vmul.f32 %v750_v29, %v745_v60 }
 0x7b9   :  { %v757_v62 = vadd.f32 %v1470_v45, %v752_v61 }
 0x7bb   :  { %1399 = vmatmul.msk.f32.gmra.mxu2 %vm88_vm0, %v757_v62  ;;  %1406 = vmatmul.msk.f32.gmra.mxu3 %vm88_vm0, %v757_v62 }
 0x7bc   :  { %1413 = vmatmul.msk.f32.gmra.mxu0 %vm88_vm0, %v757_v62 }
 0x831   :  { %v857_v63 = vpop.f32.mrf.mxu0 }
 0x832   :  { %v858_v8 = vadd.f32 %v1471_v2, %v857_v63 }
 0x834   :  { %v877_v11 = vmul.f32 %v858_v8, %v1769_v35  ;;  %v875_v17 = vmul.f32 %v858_v8, %v1785_v44  ;;  %v873_v13 = vmul.f32 %v858_v8, %v1802_v51  ;;  %v871_v26 = vmul.f32 %v858_v8, %v1816_v56 }
 0x836   :  { %v824_v6 = vpop.f32.mrf.mxu3  ;;  %v791_v0 = vpop.f32.mrf.mxu2 }
 0x837   :  { %v825_v15 = vadd.f32 %v1473_v3, %v824_v6 }
 0x839   :  { %v860_v32 = vpop.f32.mrf.mxu0  ;;  %v869_v23 = vmul.f32 %v825_v15, %v1769_v35  ;;  %v867_v21 = vmul.f32 %v825_v15, %v1785_v44  ;;  %v865_v28 = vmul.f32 %v825_v15, %v1802_v51  ;;  %v863_v44 = vmul.f32 %v825_v15, %v1816_v56 }
 0x83a   :  { %v861_v39 = vadd.f32 %v1471_v2, %v860_v32 }
 0x83c   :  { %v878_v9 = vmul.f32 %v861_v39, %v1760_v18  ;;  %v876_v12 = vmul.f32 %v861_v39, %v1776_v40  ;;  %v874_v20 = vmul.f32 %v861_v39, %v1794_v48  ;;  %v872_v24 = vmul.f32 %v861_v39, %v1809_v53 }
 0x83e   :  { %1021 = vmatpush.msra.mxu3 %v878_v9  ;;  %v827_v4 = vpop.f32.mrf.mxu3  ;;  %v794_v30 = vpop.f32.mrf.mxu2 }
 0x83f   :  { %v828_v5 = vadd.f32 %v1473_v3, %v827_v4  ;;  %v795_v51 = vadd.f32 %v1472_v22, %v794_v30 }
 0x840   :  { %1022 = vmatpush.msra.mxu3 %v877_v11 }
 0x841   :  { %v870_v19 = vmul.f32 %v828_v5, %v1760_v18  ;;  %v868_v18 = vmul.f32 %v828_v5, %v1776_v40  ;;  %v866_v35 = vmul.f32 %v828_v5, %v1794_v48  ;;  %v864_v40 = vmul.f32 %v828_v5, %v1809_v53 }
 0x842   :  { %1023 = vmatpush.msra.mxu3 %v876_v12  ;;  %v792_v48 = vadd.f32 %v1472_v22, %v791_v0 }
 0x843   :  { %1414 = vmatpush.xpose.msk.msrb.mxu1 %vm88_vm0, %v870_v19 }
 0x844   :  { %1024 = vmatpush.msra.mxu3 %v875_v17 }
 0x846   :  { %1025 = vmatpush.msra.mxu3 %v874_v20 }
 0x847   :  { %1415 = vmatpush.xpose.msk.msrb.mxu1 %vm88_vm0, %v869_v23  ;;  %v1474_v23 = vld [vmem:[%s2245_s11 + $0x1] ss:$0 sm:$0xff] }
 0x848   :  { %1026 = vmatpush.msra.mxu3 %v873_v13 }
 0x84a   :  { %1027 = vmatpush.msra.mxu3 %v872_v24 }
 0x84b   :  { %1416 = vmatpush.xpose.msk.msrb.mxu1 %vm88_vm0, %v868_v18 }
 0x84c   :  { %1028 = vmatpush.msra.mxu3 %v871_v26 }
 0x84f   :  { %1417 = vmatpush.xpose.msk.msrb.mxu1 %vm88_vm0, %v867_v21 }
 0x853   :  { %1418 = vmatpush.xpose.msk.msrb.mxu1 %vm88_vm0, %v866_v35 }
 0x857   :  { %1419 = vmatpush.xpose.msk.msrb.mxu1 %vm88_vm0, %v865_v28 }
 0x85b   :  { %1420 = vmatpush.xpose.msk.msrb.mxu1 %vm88_vm0, %v864_v40 }
 0x85f   :  { %1421 = vmatpush.xpose.msk.msrb.mxu1 %vm88_vm0, %v863_v44 }
 0x862   :  { %1422 = vmatmul.msk.f32.vlgmr.msrb.gmra.mxu1 %vm88_vm0, %v792_v48 }
 0x86a   :  { %1423 = vmatmul.msk.f32.gmra.mxu1 %vm88_vm0, %v795_v51 }
 0x8df   :  { %v926_v1 = vpop.f32.mrf.mxu1 }
 0x8e0   :  { %v932_v53 = vmul.f32 0.35355338, %v926_v1 }
 0x8e2   :  { %v934_v33 = vadd.f32 %v932_v53, %v1850_v7 }
 0x8e4   :  { %v936_v34 = vsel %vm354_vm14, %v934_v33, -inf }
 0x8e5   :  { %937 = vmax.xlane.f32.xlu2 %v936_v34  ;;  %v1439_v34 = vld [vmem:[%s2246_s12 + $0x30] sm:$0xff] }
 0x8e7   :  { %v929_v36 = vpop.f32.mrf.mxu1 }
 0x8e8   :  { %v933_v37 = vmul.f32 0.35355338, %v929_v36  ;;  %v1438_v36 = vld [vmem:[%s2246_s12 + $0x28] sm:$0xff] }
 0x8ea   :  { %v935_v56 = vadd.f32 %v933_v37, %v1857_v14  ;;  %v1431_v14 = vld [vmem:[%s2241_s7 + $0x38] sm:$0xff] }
 0x8eb   :  { %1064 = vmatpush.msra.mxu0 %v1431_v14 }
 0x8ec   :  { %v939_v38 = vsel %vm354_vm14, %v935_v56, -inf }
 0x8ed   :  { %940 = vmax.xlane.f32.xlu0 %v939_v38  ;;  %1065 = vmatpush.msra.mxu0 %v1430_v49 }
 0x8ef   :  { %1066 = vmatpush.msra.mxu0 %v1429_v50 }
 0x8f1   :  { %1067 = vmatpush.msra.mxu0 %v1428_v54 }
 0x958   :  { %v938_v25 = vpop.xlane.xlu2 %937 }
 0x959   :  { %v942_v41 = vsub.f32 %v934_v33, %v938_v25  ;;  %v1440_v33 = vld [vmem:[%s2246_s12 + $0x38] sm:$0xff] }
 0x95a   :  { %1195 = vmatpush.msra.mxu2 %v1440_v33 }
 0x95b   :  { %v944_v42 = vmul.f32 1.442695, %v942_v41 }
 0x95c   :  { %1196 = vmatpush.msra.mxu2 %v1439_v34 }
 0x95d   :  { %1515 = vpow2.f32 %v944_v42 }
 0x95e   :  { %1197 = vmatpush.msra.mxu2 %v1438_v36 }
 0x960   :  { %v941_v43 = vpop.xlane.xlu0 %940 }
 0x961   :  { %v943_v45 = vsub.f32 %v935_v56, %v941_v43  ;;  %v1437_v56 = vld [vmem:[%s2246_s12 + $0x20] sm:$0xff] }
 0x962   :  { %1198 = vmatpush.msra.mxu2 %v1437_v56  ;;  %v1445_v56 = vld [vmem:[%s2248_s14 + $0x48] sm:$0xff] }
 0x963   :  { %v1516_v46 = vpop.eup %1515  ;;  %v946_v47 = vmul.f32 1.442695, %v943_v45 }
 0x964   :  { %1424 = vmatmul.msk.f32.vlgmr.msrb.gmra.mxu2 %vm354_vm14, %v1516_v46 }
 0x965   :  { %1517 = vpow2.f32 %v946_v47 }
 0x96b   :  { %v1518_v7 = vpop.eup %1517 }
 0x96c   :  { %1425 = vmatmul.msk.f32.gmra.mxu2 %vm354_vm14, %v1518_v7 }
 0x9e7   :  { %v971_v52 = vpop.f32.mrf.mxu2 }
 0x9e8   :  { %1519 = vrcp.f32 %v971_v52  ;;  %v988_v29 = vand.u32 2147483648, %v971_v52  ;;  %v986_v60 = vand.u32 2147483647, %v971_v52  ;;  %vm982_vm5 = vweird.f32 %v971_v52 }
 0x9ea   :  { %v989_v63 = vor.u32 1.1754944e-38, %v988_v29  ;;  %vm987_vm7 = vcmp.eq.f32.partialorder %v986_v60, 8.507059e+37  ;;  %v1450_v29 = vld [vmem:[%s2248_s14 + $0x70] sm:$0xff] }
 0x9ee   :  { %v1520_v55 = vpop.eup %1519 }
 0x9ef   :  { %v978_v57 = vmul.f32 %v1520_v55, %v971_v52  ;;  %v974_v16 = vpop.f32.mrf.mxu2  ;;  %vm983_vm4 = vweird.f32 %v1520_v55 }
 0x9f0   :  { %1521 = vrcp.f32 %v974_v16  ;;  %vm984_vm6 = vmor %vm982_vm5, %vm983_vm4  ;;  %v1002_v9 = vand.u32 2147483648, %v974_v16  ;;  %v1000_v4 = vand.u32 2147483647, %v974_v16  ;;  %vm996_vm9 = vweird.f32 %v974_v16 }
 0x9f1   :  { %v979_v58 = vsub.f32 1.0, %v978_v57 }
 0x9f2   :  { %v1003_v5 = vor.u32 1.1754944e-38, %v1002_v9  ;;  %vm1001_vm11 = vcmp.eq.f32.partialorder %v1000_v4, 8.507059e+37  ;;  %v1446_v9 = vld [vmem:[%s2248_s14 + $0x50] sm:$0xff] }
 0x9f3   :  { %v980_v59 = vmul.f32 %v1520_v55, %v979_v58  ;;  %v1451_v58 = vld [vmem:[%s2248_s14 + $0x78] sm:$0xff] }
 0x9f4   :  { %1231 = vmatpush.msrb.mxu3 %v1451_v58 }
 0x9f5   :  { %v981_v61 = vadd.f32 %v1520_v55, %v980_v59 }
 0x9f6   :  { %v1522_v62 = vpop.eup %1521  ;;  %1232 = vmatpush.msrb.mxu3 %v1450_v29 }
 0x9f7   :  { %v985_v2 = vsel %vm984_vm6, %v1520_v55, %v981_v61  ;;  %v992_v6 = vmul.f32 %v1522_v62, %v974_v16  ;;  %vm997_vm8 = vweird.f32 %v1522_v62  ;;  %v1449_v61 = vld [vmem:[%s2248_s14 + $0x68] sm:$0xff] }
 0x9f8   :  { %v990_v32 = vsel %vm987_vm7, %v989_v63, %v985_v2  ;;  %vm998_vm10 = vmor %vm996_vm9, %vm997_vm8  ;;  %v1448_v63 = vld [vmem:[%s2248_s14 + $0x60] sm:$0xff]  ;;  %1233 = vmatpush.msrb.mxu3 %v1449_v61 }
 0x9f9   :  { %v993_v8 = vsub.f32 1.0, %v992_v6  ;;  %v1005_v39 = vmul.f32 %v1516_v46, %v990_v32  ;;  %v1447_v32 = vld [vmem:[%s2248_s14 + $0x58] sm:$0xff] }
 0x9fa   :  { %1234 = vmatpush.msrb.mxu3 %v1448_v63 }
 0x9fb   :  { %v994_v3 = vmul.f32 %v1522_v62, %v993_v8  ;;  %1426 = vmatmul.msk.f32.vlgmr.msra.gmra.mxu3 %vm354_vm14, %v1005_v39 }
 0x9fc   :  { %1235 = vmatpush.msrb.mxu3 %v1447_v32 }
 0x9fd   :  { %v995_v11 = vadd.f32 %v1522_v62, %v994_v3 }
 0x9fe   :  { %1236 = vmatpush.msrb.mxu3 %v1446_v9 }
 0x9ff   :  { %v999_v12 = vsel %vm998_vm10, %v1522_v62, %v995_v11 }
 0xa00   :  { %v1004_v15 = vsel %vm1001_vm11, %v1003_v5, %v999_v12  ;;  %1237 = vmatpush.msrb.mxu3 %v1445_v56 }
 0xa01   :  { %v1006_v19 = vmul.f32 %v1518_v7, %v1004_v15  ;;  %v1475_v15 = vld [vmem:[%s2250_s16 + $0x3] ss:$0 sm:$0xff] }
 0xa03   :  { %1427 = vmatmul.msk.f32.gmra.mxu3 %vm354_vm14, %v1006_v19 }
 0xa7e   :  { %v1030_v17 = vpop.f32.mrf.mxu3 }
 0xa7f   :  { %1433 = vmatmul.msk.f32.vlgmr.msra.gmra.mxu0 %vm88_vm0, %v1030_v17 }
 0xa86   :  { %v1033_v20 = vpop.f32.mrf.mxu3 }
 0xa87   :  { %1434 = vmatmul.msk.f32.gmra.mxu0 %vm88_vm0, %v1033_v20 }
 0xafc   :  { %v1069_v13 = vpop.f32.mrf.mxu0 }
 0xafd   :  { %v1070_v24 = vadd.f32 %v1474_v23, %v1069_v13 }
 0xaff   :  { %v2133_v18 = vadd.f32 %v1070_v24, %v1991_v27 }
 0xb01   :  { %v1081_v26 = vsel %vm88_vm0, %v2133_v18, 0.0 }
 0xb02   :  { %1082 = vadd.xlane.f32.xlu1 %v1081_v26 }
 0xb04   :  { %v1072_v21 = vpop.f32.mrf.mxu0 }
 0xb05   :  { %v1073_v35 = vadd.f32 %v1474_v23, %v1072_v21  ;;  %v1476_v21 = vld [vmem:[%s2251_s17 + $0x3] ss:$0 sm:$0xff] }
 0xb07   :  { %v2138_v28 = vadd.f32 %v1073_v35, %v1996_v31 }
 0xb09   :  { %v1084_v40 = vsel %vm88_vm0, %v2138_v28, 0.0 }
 0xb0a   :  { %1085 = vadd.xlane.f32.xlu2 %v1084_v40 }
 0xb75   :  { %v1083_v0 = vpop.xlane.xlu1 %1082 }
 0xb76   :  { %v1087_v22 = vmul.f32 %v1083_v0, %v1688_v10 }
 0xb78   :  { %v2144_v44 = vsub.f32 %v2133_v18, %v1087_v22 }
 0xb7a   :  { %v1091_v27 = vmul.f32 %v2144_v44, %v2144_v44  ;;  %v1158_v24 = vmul.f32 %v1475_v15, %v2144_v44 }
 0xb7c   :  { %v1093_v48 = vsel %vm88_vm0, %v1091_v27, 0.0 }
 0xb7d   :  { %1094 = vadd.xlane.f32.xlu0 %v1093_v48  ;;  %v1086_v30 = vpop.xlane.xlu2 %1085 }
 0xb7e   :  { %v1088_v31 = vmul.f32 %v1086_v30, %v1688_v10 }
 0xb80   :  { %v2151_v51 = vsub.f32 %v2138_v28, %v1088_v31 }
 0xb82   :  { %v1092_v1 = vmul.f32 %v2151_v51, %v2151_v51 }
 0xb84   :  { %v1096_v53 = vsel %vm88_vm0, %v1092_v1, 0.0 }
 0xb85   :  { %1097 = vadd.xlane.f32.xlu1 %v1096_v53  ;;  %v1159_v53 = vmul.f32 %v1475_v15, %v2151_v51  ;;  %v1477_v51 = vld [vmem:[%s2247_s13 + $0x1] ss:$0 sm:$0xff] }
 0xbf0   :  { %v1095_v37 = vpop.xlane.xlu0 %1094 }
 0xbf1   :  { %v1099_v38 = vmul.f32 0.032258064, %v1095_v37 }
 0xbf3   :  { %1523 = vrsqrt.f32 %v1099_v38  ;;  %vm1108_vm12 = vcmp.eq.f32.partialorder %v1099_v38, inf  ;;  %v1111_v54 = vand.u32 2147483648, %v1099_v38  ;;  %vm1110_vm13 = vcmp.eq.f32.partialorder %v1099_v38, 0.0 }
 0xbf8   :  { %v1098_v25 = vpop.xlane.xlu1 %1097 }
 0xbf9   :  { %v1524_v41 = vpop.eup %1523  ;;  %v1100_v42 = vmul.f32 0.032258064, %v1098_v25 }
 0xbfa   :  { %v1102_v43 = vmul.f32 %v1524_v41, %v1099_v38 }
 0xbfb   :  { %1525 = vrsqrt.f32 %v1100_v42  ;;  %vm1120_vm15 = vcmp.eq.f32.partialorder %v1100_v42, inf  ;;  %v1123_v6 = vand.u32 2147483648, %v1100_v42  ;;  %vm1122_vm1 = vcmp.eq.f32.partialorder %v1100_v42, 0.0 }
 0xbfc   :  { %v1103_v45 = vmul.f32 %v1524_v41, %v1102_v43 }
 0xbfe   :  { %v1104_v46 = vmul.f32 0.5, %v1103_v45 }
 0xc00   :  { %v1105_v47 = vsub.f32 1.5, %v1104_v46 }
 0xc01   :  { %v1526_v7 = vpop.eup %1525 }
 0xc02   :  { %v1106_v14 = vmul.f32 %v1524_v41, %v1105_v47  ;;  %v1114_v49 = vmul.f32 %v1526_v7, %v1100_v42  ;;  %v1478_v47 = vld [vmem:[%s2249_s15 + $0x1] ss:$0 sm:$0xff] }
 0xc04   :  { %v1107_v50 = vmul.f32 %v1106_v14, %v1099_v38  ;;  %v1115_v52 = vmul.f32 %v1526_v7, %v1114_v49 }
 0xc06   :  { %v1109_v55 = vsel %vm1108_vm12, %v1099_v38, %v1107_v50  ;;  %v1116_v57 = vmul.f32 0.5, %v1115_v52  ;;  %v1444_v38 = vld [vmem:[%s2248_s14 + $0x40] sm:$0xff] }
 0xc07   :  { %v1112_v16 = vsel %vm1110_vm13, %v1111_v54, %v1109_v55  ;;  %1238 = vmatpush.msrb.mxu3 %v1444_v38 }
 0xc08   :  { %v1125_v59 = vadd.f32 1e-06, %v1112_v16  ;;  %v1117_v60 = vsub.f32 1.5, %v1116_v57 }
 0xc0a   :  { %1527 = vrcp.f32 %v1125_v59  ;;  %v1118_v62 = vmul.f32 %v1526_v7, %v1117_v60  ;;  %v1138_v12 = vand.u32 2147483648, %v1125_v59  ;;  %v1136_v17 = vand.u32 2147483647, %v1125_v59 }
 0xc0b   :  { %vm1132_vm3 = vweird.f32 %v1125_v59 }
 0xc0c   :  { %v1119_v2 = vmul.f32 %v1118_v62, %v1100_v42  ;;  %v1139_v13 = vor.u32 1.1754944e-38, %v1138_v12  ;;  %vm1137_vm5 = vcmp.eq.f32.partialorder %v1136_v17, 8.507059e+37 }
 0xc0e   :  { %v1121_v8 = vsel %vm1120_vm15, %v1100_v42, %v1119_v2 }
 0xc0f   :  { %v1124_v39 = vsel %vm1122_vm1, %v1123_v6, %v1121_v8 }
 0xc10   :  { %v1528_v3 = vpop.eup %1527  ;;  %v1126_v4 = vadd.f32 1e-06, %v1124_v39 }
 0xc11   :  { %v1128_v11 = vmul.f32 %v1528_v3, %v1125_v59  ;;  %vm1133_vm2 = vweird.f32 %v1528_v3 }
 0xc12   :  { %1529 = vrcp.f32 %v1126_v4  ;;  %vm1134_vm4 = vmor %vm1132_vm3, %vm1133_vm2  ;;  %v1152_v27 = vand.u32 2147483648, %v1126_v4  ;;  %v1150_v31 = vand.u32 2147483647, %v1126_v4  ;;  %vm1146_vm7 = vweird.f32 %v1126_v4 }
 0xc13   :  { %v1129_v5 = vsub.f32 1.0, %v1128_v11 }
 0xc14   :  { %v1153_v44 = vor.u32 1.1754944e-38, %v1152_v27  ;;  %vm1151_vm9 = vcmp.eq.f32.partialorder %v1150_v31, 8.507059e+37 }
 0xc15   :  { %v1130_v19 = vmul.f32 %v1528_v3, %v1129_v5 }
 0xc17   :  { %v1131_v20 = vadd.f32 %v1528_v3, %v1130_v19 }
 0xc18   :  { %v1530_v23 = vpop.eup %1529 }
 0xc19   :  { %v1135_v26 = vsel %vm1134_vm4, %v1528_v3, %v1131_v20  ;;  %v1142_v35 = vmul.f32 %v1530_v23, %v1126_v4  ;;  %vm1147_vm6 = vweird.f32 %v1530_v23 }
 0xc1a   :  { %v1140_v40 = vsel %vm1137_vm5, %v1139_v13, %v1135_v26  ;;  %vm1148_vm8 = vmor %vm1146_vm7, %vm1147_vm6 }
 0xc1b   :  { %v1160_v0 = vmul.f32 %v1158_v24, %v1140_v40  ;;  %v1143_v22 = vsub.f32 1.0, %v1142_v35 }
 0xc1d   :  { %v1165_v48 = vadd.f32 %v1476_v21, %v1160_v0  ;;  %v1144_v30 = vmul.f32 %v1530_v23, %v1143_v22 }
 0xc1f   :  { %1442 = vmatmul.msk.f32.vlgmr.msra.gmra.mxu2 %vm88_vm0, %v1165_v48  ;;  %v1145_v1 = vadd.f32 %v1530_v23, %v1144_v30 }
 0xc21   :  { %v1149_v33 = vsel %vm1148_vm8, %v1530_v23, %v1145_v1 }
 0xc22   :  { %v1154_v34 = vsel %vm1151_vm9, %v1153_v44, %v1149_v33  ;;  %v1479_v44 = vld [vmem:[%s2252_s18] ss:$0 sm:$0xff]  ;;  %s1566_s18 = smov [#allocation2]  }
 0xc23   :  { %v1161_v36 = vmul.f32 %v1159_v53, %v1154_v34 }
 0xc25   :  { %v1166_v37 = vadd.f32 %v1476_v21, %v1161_v36 }
 0xc27   :  { %1443 = vmatmul.msk.f32.gmra.mxu2 %vm88_vm0, %v1166_v37 }
 0xca2   :  { %v1200_v25 = vpop.f32.mrf.mxu2 }
 0xca3   :  { %v1201_v41 = vadd.f32 %v1477_v51, %v1200_v25  ;;  %v1480_v25 = vld [vmem:[%s2253_s19] ss:$0 sm:$0xff]  ;;  %s1349_s19 = sshll.u32 %s1566_s18, 4  ;;  %s1350_s19 = int_to_ptr.vmem [resolvable:$true] %s1349_s19 }
 0xca5   :  { %v1206_v42 = vmax.f32 %v1201_v41, 0.0 }
 0xca7   :  { %1452 = vmatmul.msk.f32.vlgmr.msrb.gmra.mxu3 %vm354_vm14, %v1206_v42 }
 0xcaa   :  { %v1203_v43 = vpop.f32.mrf.mxu2 }
 0xcab   :  { %v1204_v45 = vadd.f32 %v1477_v51, %v1203_v43 }
 0xcad   :  { %v1207_v46 = vmax.f32 %v1204_v45, 0.0 }
 0xcaf   :  { %1453 = vmatmul.msk.f32.gmra.mxu3 %vm354_vm14, %v1207_v46 }
 0xd2a   :  { %v1240_v7 = vpop.f32.mrf.mxu3 }
 0xd2b   :  { %v1246_v14 = vadd.f32 %v1240_v7, %v2133_v18 }
 0xd2d   :  { %v1253_v49 = vadd.f32 %v1478_v47, %v1246_v14 }
 0xd2f   :  { %v1257_v50 = vsel %vm88_vm0, %v1253_v49, 0.0 }
 0xd30   :  { %1258 = vadd.xlane.f32.xlu2 %v1257_v50 }
 0xd32   :  { %v1243_v52 = vpop.f32.mrf.mxu3 }
 0xd33   :  { %v1247_v54 = vadd.f32 %v1243_v52, %v2138_v28 }
 0xd35   :  { %v1254_v55 = vadd.f32 %v1478_v47, %v1247_v54 }
 0xd37   :  { %v1260_v57 = vsel %vm88_vm0, %v1254_v55, 0.0 }
 0xd38   :  { %1261 = vadd.xlane.f32.xlu0 %v1260_v57 }
 0xda3   :  { %v1259_v16 = vpop.xlane.xlu2 %1258 }
 0xda4   :  { %v1263_v58 = vmul.f32 %v1259_v16, %v1688_v10 }
 0xda6   :  { %v1265_v29 = vsub.f32 %v1253_v49, %v1263_v58 }
 0xda8   :  { %v1267_v59 = vmul.f32 %v1265_v29, %v1265_v29  ;;  %v1334_v56 = vmul.f32 %v1479_v44, %v1265_v29 }
 0xdaa   :  { %v1269_v60 = vsel %vm88_vm0, %v1267_v59, 0.0 }
 0xdab   :  { %1270 = vadd.xlane.f32.xlu1 %v1269_v60  ;;  %v1262_v18 = vpop.xlane.xlu0 %1261 }
 0xdac   :  { %v1264_v61 = vmul.f32 %v1262_v18, %v1688_v10 }
 0xdae   :  { %v2217_v62 = vsub.f32 %v1254_v55, %v1264_v61 }
 0xdb0   :  { %v1268_v28 = vmul.f32 %v2217_v62, %v2217_v62  ;;  %v1335_v50 = vmul.f32 %v1479_v44, %v2217_v62 }
 0xdb2   :  { %v1272_v63 = vsel %vm88_vm0, %v1268_v28, 0.0 }
 0xdb3   :  { %1273 = vadd.xlane.f32.xlu2 %v1272_v63 }
 0xe1e   :  { %v1271_v2 = vpop.xlane.xlu1 %1270 }
 0xe1f   :  { %v1275_v6 = vmul.f32 0.032258064, %v1271_v2 }
 0xe21   :  { %1531 = vrsqrt.f32 %v1275_v6  ;;  %vm1284_vm14 = vcmp.eq.f32.partialorder %v1275_v6, inf  ;;  %v1287_v17 = vand.u32 2147483648, %v1275_v6  ;;  %vm1286_vm10 = vcmp.eq.f32.partialorder %v1275_v6, 0.0 }
 0xe26   :  { %v1274_v32 = vpop.xlane.xlu2 %1273 }
 0xe27   :  { %v1532_v8 = vpop.eup %1531  ;;  %v1276_v39 = vmul.f32 0.032258064, %v1274_v32 }
 0xe28   :  { %v1278_v9 = vmul.f32 %v1532_v8, %v1275_v6 }
 0xe29   :  { %1533 = vrsqrt.f32 %v1276_v39  ;;  %vm1296_vm11 = vcmp.eq.f32.partialorder %v1276_v39, inf  ;;  %v1299_v40 = vand.u32 2147483648, %v1276_v39  ;;  %vm1298_vm12 = vcmp.eq.f32.partialorder %v1276_v39, 0.0 }
 0xe2a   :  { %v1279_v3 = vmul.f32 %v1532_v8, %v1278_v9 }
 0xe2c   :  { %v1280_v4 = vmul.f32 0.5, %v1279_v3 }
 0xe2e   :  { %v1281_v11 = vsub.f32 1.5, %v1280_v4 }
 0xe2f   :  { %v1534_v10 = vpop.eup %1533 }
 0xe30   :  { %v1282_v5 = vmul.f32 %v1532_v8, %v1281_v11  ;;  %v1290_v12 = vmul.f32 %v1534_v10, %v1276_v39 }
 0xe32   :  { %v1283_v15 = vmul.f32 %v1282_v5, %v1275_v6  ;;  %v1291_v19 = vmul.f32 %v1534_v10, %v1290_v12 }
 0xe34   :  { %v1285_v20 = vsel %vm1284_vm14, %v1275_v6, %v1283_v15  ;;  %v1292_v23 = vmul.f32 0.5, %v1291_v19 }
 0xe35   :  { %v1288_v13 = vsel %vm1286_vm10, %v1287_v17, %v1285_v20 }
 0xe36   :  { %v1301_v24 = vadd.f32 1e-06, %v1288_v13  ;;  %v1293_v26 = vsub.f32 1.5, %v1292_v23 }
 0xe38   :  { %1535 = vrcp.f32 %v1301_v24  ;;  %v1294_v21 = vmul.f32 %v1534_v10, %v1293_v26  ;;  %v1314_v1 = vand.u32 2147483648, %v1301_v24  ;;  %v1312_v33 = vand.u32 2147483647, %v1301_v24 }
 0xe39   :  { %vm1308_vm15 = vweird.f32 %v1301_v24 }
 0xe3a   :  { %v1295_v35 = vmul.f32 %v1294_v21, %v1276_v39  ;;  %v1315_v37 = vor.u32 1.1754944e-38, %v1314_v1  ;;  %vm1313_vm2 = vcmp.eq.f32.partialorder %v1312_v33, 8.507059e+37 }
 0xe3c   :  { %v1297_v0 = vsel %vm1296_vm11, %v1276_v39, %v1295_v35 }
 0xe3d   :  { %v1300_v22 = vsel %vm1298_vm12, %v1299_v40, %v1297_v0 }
 0xe3e   :  { %v1536_v27 = vpop.eup %1535  ;;  %v1302_v48 = vadd.f32 1e-06, %v1300_v22 }
 0xe3f   :  { %v1304_v30 = vmul.f32 %v1536_v27, %v1301_v24  ;;  %vm1309_vm13 = vweird.f32 %v1536_v27 }
 0xe40   :  { %1537 = vrcp.f32 %v1302_v48  ;;  %vm1310_vm1 = vmor %vm1308_vm15, %vm1309_vm13  ;;  %v1328_v45 = vand.u32 2147483648, %v1302_v48  ;;  %v1326_v47 = vand.u32 2147483647, %v1302_v48  ;;  %vm1322_vm4 = vweird.f32 %v1302_v48 }
 0xe41   :  { %v1305_v31 = vsub.f32 1.0, %v1304_v30 }
 0xe42   :  { %v1329_v49 = vor.u32 1.1754944e-38, %v1328_v45  ;;  %vm1327_vm6 = vcmp.eq.f32.partialorder %v1326_v47, 8.507059e+37 }
 0xe43   :  { %v1306_v53 = vmul.f32 %v1536_v27, %v1305_v31 }
 0xe45   :  { %v1307_v34 = vadd.f32 %v1536_v27, %v1306_v53 }
 0xe46   :  { %v1538_v36 = vpop.eup %1537 }
 0xe47   :  { %v1311_v38 = vsel %vm1310_vm1, %v1536_v27, %v1307_v34  ;;  %v1318_v51 = vmul.f32 %v1538_v36, %v1302_v48  ;;  %vm1323_vm3 = vweird.f32 %v1538_v36 }
 0xe48   :  { %v1316_v41 = vsel %vm1313_vm2, %v1315_v37, %v1311_v38  ;;  %vm1324_vm5 = vmor %vm1322_vm4, %vm1323_vm3 }
 0xe49   :  { %v1319_v42 = vsub.f32 1.0, %v1318_v51  ;;  %v1336_v43 = vmul.f32 %v1334_v56, %v1316_v41 }
 0xe4b   :  { %v1320_v46 = vmul.f32 %v1538_v36, %v1319_v42  ;;  %v1341_v7 = vadd.f32 %v1480_v25, %v1336_v43 }
 0xe4d   :  { %v1321_v14 = vadd.f32 %v1538_v36, %v1320_v46  ;;  %1343 = vst.msk [vmem:[#allocation2] sm:$0xff] %vm88_vm0, %v1341_v7 }
 0xe4f   :  { %v1325_v52 = vsel %vm1324_vm5, %v1538_v36, %v1321_v14 }
 0xe50   :  { %v1330_v54 = vsel %vm1327_vm6, %v1329_v49, %v1325_v52 }
 0xe51   :  { %v1337_v55 = vmul.f32 %v1335_v50, %v1330_v54 }
 0xe53   :  { %v1342_v57 = vadd.f32 %v1480_v25, %v1337_v55 }
 0xe55   :  { %1344 = vst.msk [vmem:[#allocation2 + $0x8] sm:$0xff] %vm88_vm0, %v1342_v57 }
 0xe56   :  { %1357 = dma.vmem_to_hbm [thread:$0]  %s1350_s19, 256, %s1352_s29, [#allocation3], %s1567_s9, %s1567_s9, %s1568_s10  }
 0xe57   :  { %1563 = dma.done.wait [#allocation3], 256  }
 0xe58   :  { %1564 = vsyncadd [#allocation3], 4294967040 }
 0xe59   :  { %1362 = vsyncpa [#allocation3], 1 }

</bundles_post_ra>
